<compile_context>
chip_gen: v7x
topology: tpu7x:2x2x1
jax: 0.10.0
libtpu: 0.0.40
codegen_flags: <defaults>
</compile_context>

<pallas_src>
import math
import functools

import jax
import jax.numpy as jnp
import numpy as np
from jax.experimental import pallas as pl
from jax.experimental.pallas import tpu as pltpu

LANE = 128


def _round_up(x, m):
    return ((x + m - 1) // m) * m


# ---------------------------------------------------------------------------
# Pallas kernel: one (level, batch) row per grid step
#   (conv3 + bias)*mask -> relu -> (conv3 + bias)*mask -> relu -> (cls conv3 + bias)*mask
# ---------------------------------------------------------------------------
def _cls_head_kernel(vlen_ref, x_ref, w1_ref, b1_ref, w2_ref, b2_ref,
                     wc_ref, bc_ref, o_ref, *, T):
    g = pl.program_id(0)
    valid_len = vlen_ref[g]                                    # scalar from SMEM

    x = x_ref[0]                                               # (T, Cp) bf16, straight from DMA

    # Hoisted once per grid step and reused by all three convs (JAX does not CSE
    # broadcast_in_dim, so do NOT re-materialize these per conv).
    ids = jax.lax.broadcasted_iota(jnp.int32, (T, 1), 0)
    not_first = ids > 0                                        # position t-1 exists
    not_last = ids < (T - 1)                                   # position t+1 exists
    m = (ids < valid_len).astype(jnp.float32)                  # (T, 1) validity mask

    def conv3(h_bf, w_ref, b_ref):
        """3-tap 'same' conv: out[t] = h[t-1]@W0 + h[t]@W1 + h[t+1]@W2 + b (zero pad).
        Three bf16 MXU dots with f32 accumulation; the +/-1 taps are realized by
        rolling/masking the (T, Cout) f32 partials (no shifted-input copies, no
        tap-staging scratch, rolls stay in safe f32 sublane form)."""
        y0 = jnp.dot(h_bf, w_ref[0], preferred_element_type=jnp.float32)
        y1 = jnp.dot(h_bf, w_ref[1], preferred_element_type=jnp.float32)
        y2 = jnp.dot(h_bf, w_ref[2], preferred_element_type=jnp.float32)
        y0 = jnp.where(not_first, pltpu.roll(y0, 1, axis=0), 0.0)      # contributes y0[t-1]
        y2 = jnp.where(not_last, pltpu.roll(y2, T - 1, axis=0), 0.0)   # contributes y2[t+1]
        return y0 + y1 + y2 + b_ref[...]

    # MaskedConv1D -> Identity norm -> ReLU   (x2)
    h = jnp.maximum(conv3(x, w1_ref, b1_ref) * m, 0.0)
    h = jnp.maximum(conv3(h.astype(jnp.bfloat16), w2_ref, b2_ref) * m, 0.0)
    # final cls MaskedConv1D (no activation); output is lane-dense (NCp = mult of 128)
    o_ref[0] = (conv3(h.astype(jnp.bfloat16), wc_ref, bc_ref) * m).astype(o_ref.dtype)


def _vmem_cap_bytes():
    try:
        return int(pltpu.get_tpu_info().vmem_capacity_bytes)
    except Exception:
        return 64 * 1024 * 1024        # conservative (v7x per-TC VMEM)


def _cls_head_call(x_all, vlen_all, ws, *, T, out_dtype):
    """x_all: (G, T, Cp) bf16 — one FPN length-bucket stacked on rows; vlen_all: (G,) int32."""
    G, _, Cp = x_all.shape
    w1, b1, w2, b2, wc, bc = ws
    Fp = w2.shape[1]
    NCp = wc.shape[2]

    kern = functools.partial(_cls_head_kernel, T=T)

    # Explicit VMEM budget derived from the block sizes (review item), capped to device VMEM.
    out_bytes = jnp.dtype(out_dtype).itemsize
    est = (2 * T * Cp * 2                                        # x block, bf16, double-buffered
           + 2 * T * NCp * out_bytes                             # out block, double-buffered
           + sum(int(a.size) * a.dtype.itemsize for a in ws)     # resident weights / biases
           + 4 * T * max(Cp, Fp) * 4)                            # live f32/bf16 intermediates
    vmem_limit = int(max(32 * 1024 * 1024,
                         min(2 * est, int(0.9 * _vmem_cap_bytes()))))

    def build(single_buffer_weights):
        def wspec(a):
            nd = a.ndim
            if single_buffer_weights:
                # constant index map -> double-buffering buys nothing; save the VMEM
                return pl.BlockSpec(a.shape, lambda g, vl, _nd=nd: (0,) * _nd,
                                    pipeline_mode=pl.Buffered(1))
            return pl.BlockSpec(a.shape, lambda g, vl, _nd=nd: (0,) * _nd)

        return pl.pallas_call(
            kern,
            out_shape=jax.ShapeDtypeStruct((G, T, NCp), out_dtype),
            grid_spec=pltpu.PrefetchScalarGridSpec(
                num_scalar_prefetch=1,
                grid=(G,),
                in_specs=[pl.BlockSpec((1, T, Cp), lambda g, vl: (g, 0, 0))]
                         + [wspec(a) for a in ws],
                out_specs=pl.BlockSpec((1, T, NCp), lambda g, vl: (g, 0, 0)),
            ),
            compiler_params=pltpu.CompilerParams(
                # rows are independent -> megacore sharding on v7x (G >= 2 per bucket
                # whenever batch >= 2, so both TensorCores get work)
                dimension_semantics=("parallel",),
                vmem_limit_bytes=vmem_limit),
        )

    # Single-buffer the resident weights; fall back to default buffering if rejected.
    try:
        return build(True)(vlen_all, x_all, *ws)
    except Exception:
        return build(False)(vlen_all, x_all, *ws)


def _bucket_levels(level_Ts, max_rel_waste=0.25):
    """Group FPN levels so padding a level to its bucket length wastes <= ~max_rel_waste
    of its rows (review item 1: never pad everything to T_max)."""
    order = sorted(range(len(level_Ts)), key=lambda i: -level_Ts[i])
    buckets = []                                   # [[T_bucket, [level ids]], ...]
    for li in order:
        T8 = _round_up(level_Ts[li], 8)
        placed = False
        for b in buckets:
            if b[0] - T8 <= int(max_rel_waste * level_Ts[li]):
                b[1].append(li)
                placed = True
                break
        if not placed:
            buckets.append([T8, [li]])
    return [(b[0], b[1]) for b in buckets]


# ---------------------------------------------------------------------------
# Module wrapper (matches PtTransformerClsHead.forward semantics, with_ln=False)
# ---------------------------------------------------------------------------
def init_params(key, input_dim, feat_dim, num_classes, *, num_layers=3, K=3,
                prior_prob=0.01, empty_cls=()):
    """Deterministic synthetic weight init (shapes per the PyTorch module)."""
    assert num_layers == 3, "this script instantiates the default num_layers=3"
    k1, k2, k3 = jax.random.split(key, 3)

    def winit(k, cin, cout):
        scale = 1.0 / math.sqrt(cin * K)
        # weight stored as (K, Cin, Cout) for the channels-last kernel
        return jax.random.uniform(k, (K, cin, cout), jnp.float32, -scale, scale)

    w1 = winit(k1, input_dim, feat_dim)
    b1 = jnp.zeros((1, feat_dim), jnp.float32)          # MaskedConv1D bias init = 0
    w2 = winit(k2, feat_dim, feat_dim)
    b2 = jnp.zeros((1, feat_dim), jnp.float32)
    wc = winit(k3, feat_dim, num_classes)
    bias_value = -math.log((1 - prior_prob) / prior_prob)
    bc = jnp.full((1, num_classes), bias_value, jnp.float32)
    if len(empty_cls) > 0:
        empty_val = -math.log((1 - 1e-6) / 1e-6)
        bc = bc.at[0, jnp.asarray(list(empty_cls))].set(empty_val)
    return (w1, b1, w2, b2, wc, bc)


def pt_transformer_cls_head_forward(fpn_feats, fpn_masks, params, *, K=3,
                                    out_dtype=jnp.float32):
    """fpn_feats: tuple of (B, C, T) f32; fpn_masks: tuple of (B, 1, T) bool.

    Returns tuple of (B, num_classes, T) f32 logits (PyTorch layout)."""
    assert len(fpn_feats) == len(fpn_masks)
    w1, b1, w2, b2, wc, bc = params
    K_, Cin, F = w1.shape
    assert K_ == K == 3
    NC = wc.shape[2]
    B = fpn_feats[0].shape[0]
    L = len(fpn_feats)
    level_Ts = [int(f.shape[2]) for f in fpn_feats]

    Cp = _round_up(Cin, LANE)      # lane-pad channel dims so MXU dims / stores are 128-aligned
    Fp = _round_up(F, LANE)
    NCp = _round_up(NC, LANE)

    # ---- pad conv weights (K, Ci, Co) -> (K, Cip, Cop) bf16; biases (1, Cop) f32 ----
    def prep_w(w, cip, cop):
        k, ci, co = w.shape
        return jnp.pad(w, ((0, 0), (0, cip - ci), (0, cop - co))).astype(jnp.bfloat16)

    def prep_b(b, cop):
        return jnp.pad(b, ((0, 0), (0, cop - b.shape[1]))).astype(jnp.float32)

    ws = (prep_w(w1, Cp, Fp), prep_b(b1, Fp),
          prep_w(w2, Fp, Fp), prep_b(b2, Fp),
          prep_w(wc, Fp, NCp), prep_b(bc, NCp))

    # ---- bucket FPN levels by length; one pallas_call per bucket (no T_max padding) ----
    out_logits = [None] * L
    for T_b, lvl_ids in _bucket_levels(level_Ts):
        xs, vlens = [], []
        for li in lvl_ids:
            f, msk = fpn_feats[li], fpn_masks[li]
            T = level_Ts[li]
            # bf16 BEFORE the transpose/pad: halves layout-plumbing + x HBM traffic.
            # TODO(synk): accept channels-last bf16 features upstream so this transpose
            # (and the output transpose) disappear entirely.
            x = jnp.transpose(f.astype(jnp.bfloat16), (0, 2, 1))            # (B, T, Cin)
            x = jnp.pad(x, ((0, 0), (0, T_b - T), (0, Cp - Cin)))           # zero pad == conv 'same' pad
            xs.append(x)
            # TODO(synk): masks are treated as prefix (valid-length) masks, as ActionFormer
            # builds them; general bool masks with interior holes would need the full
            # (B,1,T) mask instead of a scalar-prefetched length.
            vlens.append(jnp.sum(msk.astype(jnp.int32), axis=(1, 2)))       # (B,)
        x_all = xs[0] if len(xs) == 1 else jnp.concatenate(xs, axis=0)      # (nB, T_b, Cp)
        vlen_all = (vlens[0] if len(vlens) == 1
                    else jnp.concatenate(vlens, axis=0)).astype(jnp.int32)

        out = _cls_head_call(x_all, vlen_all, ws, T=T_b, out_dtype=out_dtype)

        for j, li in enumerate(lvl_ids):
            o = out[j * B:(j + 1) * B, :level_Ts[li], :NC]                  # (B, T, NC)
            out_logits[li] = jnp.transpose(o, (0, 2, 1)).astype(jnp.float32)  # (B, NC, T)
    return tuple(out_logits)


# ---------------------------------------------------------------------------
# Pure-JAX reference (lax.conv, f32) for a correctness check
# ---------------------------------------------------------------------------
def _ref_forward(fpn_feats, fpn_masks, params, *, K=3):
    w1, b1, w2, b2, wc, bc = params

    def conv1d(x_bct, w_kio, b):
        w_oik = jnp.transpose(w_kio, (2, 1, 0))   # (Cout, Cin, K)
        y = jax.lax.conv_general_dilated(
            x_bct, w_oik, window_strides=(1,), padding=((K // 2, K // 2),),
            dimension_numbers=("NCH", "OIH", "NCH"))
        return y + b.reshape(1, -1, 1)

    outs = ()
    for x, m in zip(fpn_feats, fpn_masks):
        mf = m.astype(jnp.float32)
        h = jnp.maximum(conv1d(x, w1, b1) * mf, 0.0)
        h = jnp.maximum(conv1d(h, w2, b2) * mf, 0.0)
        outs += (conv1d(h, wc, bc) * mf,)
    return outs


if __name__ == "__main__":
    B = 2
    input_dim = 32
    feat_dim = 32
    num_classes = 8
    level_lengths = (16, 8)   # small FPN pyramid

    key = jax.random.PRNGKey(0)
    kp, *kfeat = jax.random.split(key, 1 + len(level_lengths))
    params = init_params(kp, input_dim, feat_dim, num_classes)

    fpn_feats = tuple(
        jax.random.normal(kfeat[i], (B, input_dim, T), jnp.float32)
        for i, T in enumerate(level_lengths)
    )
    fpn_masks = []
    for T in level_lengths:
        # batch 0 fully valid, batch 1 has the last T//4 positions masked out
        pos = jnp.arange(T)[None, None, :]
        valid_len = jnp.array([T, T - T // 4]).reshape(B, 1, 1)
        fpn_masks.append(pos < valid_len)
    fpn_masks = tuple(fpn_masks)

    out = pt_transformer_cls_head_forward(fpn_feats, fpn_masks, params)
    out = jax.block_until_ready(out)

    ref = _ref_forward(fpn_feats, fpn_masks, params)
    for o, r, T in zip(out, ref, level_lengths):
        assert o.shape == (B, num_classes, T), o.shape
        # bf16 MXU inputs with f32 accumulation -> loosened tolerance vs f32 reference
        np.testing.assert_allclose(np.asarray(o), np.asarray(r),
                                   rtol=2e-2, atol=2e-2)

    print("KERNEL_OK")
</pallas_src>

<mosaic_0001>
module attributes {stable_mosaic.version = 11 : i64} {
  func.func @_cls_head_kernel(%arg0: i32, %arg1: memref<2xi32, #tpu.memory_space<smem>>, %arg2: memref<1x16x128xbf16, #tpu.memory_space<vmem>>, %arg3: memref<3x128x128xbf16, #tpu.memory_space<vmem>>, %arg4: memref<1x128xf32, #tpu.memory_space<vmem>>, %arg5: memref<3x128x128xbf16, #tpu.memory_space<vmem>>, %arg6: memref<1x128xf32, #tpu.memory_space<vmem>>, %arg7: memref<3x128x128xbf16, #tpu.memory_space<vmem>>, %arg8: memref<1x128xf32, #tpu.memory_space<vmem>>, %arg9: memref<1x16x128xf32, #tpu.memory_space<vmem>>) attributes {dimension_semantics = [#tpu.dimension_semantics<parallel>], iteration_bounds = array<i64: 2>, scalar_prefetch = 1 : i64, scratch_operands = 0 : i64, tpu.core_type = #tpu.core_type<tc>, window_params = [{transform_indices = @transform_0, window_bounds = array<i64: 1, 16, 128>}, {pipeline_mode = #tpu.pipeline_mode<synchronous>, transform_indices = @transform_1, window_bounds = array<i64: 3, 128, 128>}, {pipeline_mode = #tpu.pipeline_mode<synchronous>, transform_indices = @transform_2, window_bounds = array<i64: 1, 128>}, {pipeline_mode = #tpu.pipeline_mode<synchronous>, transform_indices = @transform_3, window_bounds = array<i64: 3, 128, 128>}, {pipeline_mode = #tpu.pipeline_mode<synchronous>, transform_indices = @transform_4, window_bounds = array<i64: 1, 128>}, {pipeline_mode = #tpu.pipeline_mode<synchronous>, transform_indices = @transform_5, window_bounds = array<i64: 3, 128, 128>}, {pipeline_mode = #tpu.pipeline_mode<synchronous>, transform_indices = @transform_6, window_bounds = array<i64: 1, 128>}, {transform_indices = @transform_7, window_bounds = array<i64: 1, 16, 128>}]} {
    %0 = arith.index_cast %arg0 : i32 to index
    %1 = memref.load %arg1[%0] : memref<2xi32, #tpu.memory_space<smem>>
    %c0 = arith.constant 0 : index
    %c0_0 = arith.constant 0 : index
    %c0_1 = arith.constant 0 : index
    %2 = vector.load %arg2[%c0, %c0_0, %c0_1] : memref<1x16x128xbf16, #tpu.memory_space<vmem>>, vector<1x16x128xbf16>
    %3 = vector.shape_cast %2 : vector<1x16x128xbf16> to vector<16x128xbf16>
    %4 = tpu.iota {dimensions = array<i32: 0>} : vector<16x1xi32>
    %c0_i32 = arith.constant 0 : i32
    %5 = vector.broadcast %c0_i32 : i32 to vector<16x1xi32>
    %6 = arith.cmpi sgt, %4, %5 : vector<16x1xi32>
    %c15_i32 = arith.constant 15 : i32
    %7 = vector.broadcast %c15_i32 : i32 to vector<16x1xi32>
    %8 = arith.cmpi slt, %4, %7 : vector<16x1xi32>
    %9 = vector.broadcast %1 : i32 to vector<16x1xi32>
    %10 = arith.cmpi slt, %4, %9 : vector<16x1xi32>
    %11 = arith.extui %10 : vector<16x1xi1> to vector<16x1xi32>
    %12 = arith.sitofp %11 : vector<16x1xi32> to vector<16x1xf32>
    %c0_2 = arith.constant 0 : index
    %c0_3 = arith.constant 0 : index
    %c0_4 = arith.constant 0 : index
    %13 = vector.load %arg3[%c0_2, %c0_3, %c0_4] : memref<3x128x128xbf16, #tpu.memory_space<vmem>>, vector<1x128x128xbf16>
    %14 = vector.shape_cast %13 : vector<1x128x128xbf16> to vector<128x128xbf16>
    %cst = arith.constant dense<0.000000e+00> : vector<16x128xf32>
    %15 = tpu.matmul %3, %14, %cst {dimension_numbers = #tpu.dot_dimension_numbers<[1], [0], [0], [1], [0, 0, 1, 1], [], []>} : vector<16x128xbf16>, vector<128x128xbf16>, vector<16x128xf32> -> vector<16x128xf32>
    %c1 = arith.constant 1 : index
    %c0_5 = arith.constant 0 : index
    %c0_6 = arith.constant 0 : index
    %16 = vector.load %arg3[%c1, %c0_5, %c0_6] : memref<3x128x128xbf16, #tpu.memory_space<vmem>>, vector<1x128x128xbf16>
    %17 = vector.shape_cast %16 : vector<1x128x128xbf16> to vector<128x128xbf16>
    %cst_7 = arith.constant dense<0.000000e+00> : vector<16x128xf32>
    %18 = tpu.matmul %3, %17, %cst_7 {dimension_numbers = #tpu.dot_dimension_numbers<[1], [0], [0], [1], [0, 0, 1, 1], [], []>} : vector<16x128xbf16>, vector<128x128xbf16>, vector<16x128xf32> -> vector<16x128xf32>
    %c2 = arith.constant 2 : index
    %c0_8 = arith.constant 0 : index
    %c0_9 = arith.constant 0 : index
    %19 = vector.load %arg3[%c2, %c0_8, %c0_9] : memref<3x128x128xbf16, #tpu.memory_space<vmem>>, vector<1x128x128xbf16>
    %20 = vector.shape_cast %19 : vector<1x128x128xbf16> to vector<128x128xbf16>
    %cst_10 = arith.constant dense<0.000000e+00> : vector<16x128xf32>
    %21 = tpu.matmul %3, %20, %cst_10 {dimension_numbers = #tpu.dot_dimension_numbers<[1], [0], [0], [1], [0, 0, 1, 1], [], []>} : vector<16x128xbf16>, vector<128x128xbf16>, vector<16x128xf32> -> vector<16x128xf32>
    %c1_i32 = arith.constant 1 : i32
    %22 = tpu.dynamic_rotate %15 by %c1_i32 dim 0 : vector<16x128xf32>, i32 -> vector<16x128xf32>
    %cst_11 = arith.constant 0.000000e+00 : f32
    %23 = vector.shape_cast %6 : vector<16x1xi1> to vector<16x1xi1>
    %24 = vector.broadcast %23 : vector<16x1xi1> to vector<16x128xi1>
    %25 = vector.broadcast %cst_11 : f32 to vector<16x128xf32>
    %26 = arith.select %24, %22, %25 : vector<16x128xi1>, vector<16x128xf32>
    %c15_i32_12 = arith.constant 15 : i32
    %27 = tpu.dynamic_rotate %21 by %c15_i32_12 dim 0 : vector<16x128xf32>, i32 -> vector<16x128xf32>
    %cst_13 = arith.constant 0.000000e+00 : f32
    %28 = vector.shape_cast %8 : vector<16x1xi1> to vector<16x1xi1>
    %29 = vector.broadcast %28 : vector<16x1xi1> to vector<16x128xi1>
    %30 = vector.broadcast %cst_13 : f32 to vector<16x128xf32>
    %31 = arith.select %29, %27, %30 : vector<16x128xi1>, vector<16x128xf32>
    %32 = arith.addf %26, %18 : vector<16x128xf32>
    %33 = arith.addf %32, %31 : vector<16x128xf32>
    %c0_14 = arith.constant 0 : index
    %c0_15 = arith.constant 0 : index
    %34 = vector.load %arg4[%c0_14, %c0_15] : memref<1x128xf32, #tpu.memory_space<vmem>>, vector<1x128xf32>
    %35 = vector.broadcast %34 : vector<1x128xf32> to vector<16x128xf32>
    %36 = arith.addf %33, %35 : vector<16x128xf32>
    %37 = vector.broadcast %12 : vector<16x1xf32> to vector<16x128xf32>
    %38 = arith.mulf %36, %37 : vector<16x128xf32>
    %cst_16 = arith.constant 0.000000e+00 : f32
    %39 = vector.broadcast %cst_16 : f32 to vector<16x128xf32>
    %40 = arith.maximumf %38, %39 : vector<16x128xf32>
    %41 = arith.truncf %40 : vector<16x128xf32> to vector<16x128xbf16>
    %c0_17 = arith.constant 0 : index
    %c0_18 = arith.constant 0 : index
    %c0_19 = arith.constant 0 : index
    %42 = vector.load %arg5[%c0_17, %c0_18, %c0_19] : memref<3x128x128xbf16, #tpu.memory_space<vmem>>, vector<1x128x128xbf16>
    %43 = vector.shape_cast %42 : vector<1x128x128xbf16> to vector<128x128xbf16>
    %cst_20 = arith.constant dense<0.000000e+00> : vector<16x128xf32>
    %44 = tpu.matmul %41, %43, %cst_20 {dimension_numbers = #tpu.dot_dimension_numbers<[1], [0], [0], [1], [0, 0, 1, 1], [], []>} : vector<16x128xbf16>, vector<128x128xbf16>, vector<16x128xf32> -> vector<16x128xf32>
    %c1_21 = arith.constant 1 : index
    %c0_22 = arith.constant 0 : index
    %c0_23 = arith.constant 0 : index
    %45 = vector.load %arg5[%c1_21, %c0_22, %c0_23] : memref<3x128x128xbf16, #tpu.memory_space<vmem>>, vector<1x128x128xbf16>
    %46 = vector.shape_cast %45 : vector<1x128x128xbf16> to vector<128x128xbf16>
    %cst_24 = arith.constant dense<0.000000e+00> : vector<16x128xf32>
    %47 = tpu.matmul %41, %46, %cst_24 {dimension_numbers = #tpu.dot_dimension_numbers<[1], [0], [0], [1], [0, 0, 1, 1], [], []>} : vector<16x128xbf16>, vector<128x128xbf16>, vector<16x128xf32> -> vector<16x128xf32>
    %c2_25 = arith.constant 2 : index
    %c0_26 = arith.constant 0 : index
    %c0_27 = arith.constant 0 : index
    %48 = vector.load %arg5[%c2_25, %c0_26, %c0_27] : memref<3x128x128xbf16, #tpu.memory_space<vmem>>, vector<1x128x128xbf16>
    %49 = vector.shape_cast %48 : vector<1x128x128xbf16> to vector<128x128xbf16>
    %cst_28 = arith.constant dense<0.000000e+00> : vector<16x128xf32>
    %50 = tpu.matmul %41, %49, %cst_28 {dimension_numbers = #tpu.dot_dimension_numbers<[1], [0], [0], [1], [0, 0, 1, 1], [], []>} : vector<16x128xbf16>, vector<128x128xbf16>, vector<16x128xf32> -> vector<16x128xf32>
    %c1_i32_29 = arith.constant 1 : i32
    %51 = tpu.dynamic_rotate %44 by %c1_i32_29 dim 0 : vector<16x128xf32>, i32 -> vector<16x128xf32>
    %cst_30 = arith.constant 0.000000e+00 : f32
    %52 = vector.shape_cast %6 : vector<16x1xi1> to vector<16x1xi1>
    %53 = vector.broadcast %52 : vector<16x1xi1> to vector<16x128xi1>
    %54 = vector.broadcast %cst_30 : f32 to vector<16x128xf32>
    %55 = arith.select %53, %51, %54 : vector<16x128xi1>, vector<16x128xf32>
    %c15_i32_31 = arith.constant 15 : i32
    %56 = tpu.dynamic_rotate %50 by %c15_i32_31 dim 0 : vector<16x128xf32>, i32 -> vector<16x128xf32>
    %cst_32 = arith.constant 0.000000e+00 : f32
    %57 = vector.shape_cast %8 : vector<16x1xi1> to vector<16x1xi1>
    %58 = vector.broadcast %57 : vector<16x1xi1> to vector<16x128xi1>
    %59 = vector.broadcast %cst_32 : f32 to vector<16x128xf32>
    %60 = arith.select %58, %56, %59 : vector<16x128xi1>, vector<16x128xf32>
    %61 = arith.addf %55, %47 : vector<16x128xf32>
    %62 = arith.addf %61, %60 : vector<16x128xf32>
    %c0_33 = arith.constant 0 : index
    %c0_34 = arith.constant 0 : index
    %63 = vector.load %arg6[%c0_33, %c0_34] : memref<1x128xf32, #tpu.memory_space<vmem>>, vector<1x128xf32>
    %64 = vector.broadcast %63 : vector<1x128xf32> to vector<16x128xf32>
    %65 = arith.addf %62, %64 : vector<16x128xf32>
    %66 = vector.broadcast %12 : vector<16x1xf32> to vector<16x128xf32>
    %67 = arith.mulf %65, %66 : vector<16x128xf32>
    %cst_35 = arith.constant 0.000000e+00 : f32
    %68 = vector.broadcast %cst_35 : f32 to vector<16x128xf32>
    %69 = arith.maximumf %67, %68 : vector<16x128xf32>
    %70 = arith.truncf %69 : vector<16x128xf32> to vector<16x128xbf16>
    %c0_36 = arith.constant 0 : index
    %c0_37 = arith.constant 0 : index
    %c0_38 = arith.constant 0 : index
    %71 = vector.load %arg7[%c0_36, %c0_37, %c0_38] : memref<3x128x128xbf16, #tpu.memory_space<vmem>>, vector<1x128x128xbf16>
    %72 = vector.shape_cast %71 : vector<1x128x128xbf16> to vector<128x128xbf16>
    %cst_39 = arith.constant dense<0.000000e+00> : vector<16x128xf32>
    %73 = tpu.matmul %70, %72, %cst_39 {dimension_numbers = #tpu.dot_dimension_numbers<[1], [0], [0], [1], [0, 0, 1, 1], [], []>} : vector<16x128xbf16>, vector<128x128xbf16>, vector<16x128xf32> -> vector<16x128xf32>
    %c1_40 = arith.constant 1 : index
    %c0_41 = arith.constant 0 : index
    %c0_42 = arith.constant 0 : index
    %74 = vector.load %arg7[%c1_40, %c0_41, %c0_42] : memref<3x128x128xbf16, #tpu.memory_space<vmem>>, vector<1x128x128xbf16>
    %75 = vector.shape_cast %74 : vector<1x128x128xbf16> to vector<128x128xbf16>
    %cst_43 = arith.constant dense<0.000000e+00> : vector<16x128xf32>
    %76 = tpu.matmul %70, %75, %cst_43 {dimension_numbers = #tpu.dot_dimension_numbers<[1], [0], [0], [1], [0, 0, 1, 1], [], []>} : vector<16x128xbf16>, vector<128x128xbf16>, vector<16x128xf32> -> vector<16x128xf32>
    %c2_44 = arith.constant 2 : index
    %c0_45 = arith.constant 0 : index
    %c0_46 = arith.constant 0 : index
    %77 = vector.load %arg7[%c2_44, %c0_45, %c0_46] : memref<3x128x128xbf16, #tpu.memory_space<vmem>>, vector<1x128x128xbf16>
    %78 = vector.shape_cast %77 : vector<1x128x128xbf16> to vector<128x128xbf16>
    %cst_47 = arith.constant dense<0.000000e+00> : vector<16x128xf32>
    %79 = tpu.matmul %70, %78, %cst_47 {dimension_numbers = #tpu.dot_dimension_numbers<[1], [0], [0], [1], [0, 0, 1, 1], [], []>} : vector<16x128xbf16>, vector<128x128xbf16>, vector<16x128xf32> -> vector<16x128xf32>
    %c1_i32_48 = arith.constant 1 : i32
    %80 = tpu.dynamic_rotate %73 by %c1_i32_48 dim 0 : vector<16x128xf32>, i32 -> vector<16x128xf32>
    %cst_49 = arith.constant 0.000000e+00 : f32
    %81 = vector.shape_cast %6 : vector<16x1xi1> to vector<16x1xi1>
    %82 = vector.broadcast %81 : vector<16x1xi1> to vector<16x128xi1>
    %83 = vector.broadcast %cst_49 : f32 to vector<16x128xf32>
    %84 = arith.select %82, %80, %83 : vector<16x128xi1>, vector<16x128xf32>
    %c15_i32_50 = arith.constant 15 : i32
    %85 = tpu.dynamic_rotate %79 by %c15_i32_50 dim 0 : vector<16x128xf32>, i32 -> vector<16x128xf32>
    %cst_51 = arith.constant 0.000000e+00 : f32
    %86 = vector.shape_cast %8 : vector<16x1xi1> to vector<16x1xi1>
    %87 = vector.broadcast %86 : vector<16x1xi1> to vector<16x128xi1>
    %88 = vector.broadcast %cst_51 : f32 to vector<16x128xf32>
    %89 = arith.select %87, %85, %88 : vector<16x128xi1>, vector<16x128xf32>
    %90 = arith.addf %84, %76 : vector<16x128xf32>
    %91 = arith.addf %90, %89 : vector<16x128xf32>
    %c0_52 = arith.constant 0 : index
    %c0_53 = arith.constant 0 : index
    %92 = vector.load %arg8[%c0_52, %c0_53] : memref<1x128xf32, #tpu.memory_space<vmem>>, vector<1x128xf32>
    %93 = vector.broadcast %92 : vector<1x128xf32> to vector<16x128xf32>
    %94 = arith.addf %91, %93 : vector<16x128xf32>
    %95 = vector.broadcast %12 : vector<16x1xf32> to vector<16x128xf32>
    %96 = arith.mulf %94, %95 : vector<16x128xf32>
    %c0_54 = arith.constant 0 : index
    %c0_55 = arith.constant 0 : index
    %c0_56 = arith.constant 0 : index
    %97 = vector.load %arg9[%c0_54, %c0_55, %c0_56] : memref<1x16x128xf32, #tpu.memory_space<vmem>>, vector<1x16x128xf32>
    %98 = vector.shape_cast %97 : vector<1x16x128xf32> to vector<16x128xf32>
    %99 = vector.shape_cast %96 : vector<16x128xf32> to vector<1x16x128xf32>
    tpu.vector_store %arg9[%c0_54, %c0_55, %c0_56], %99 {strides = array<i32>} : memref<1x16x128xf32, #tpu.memory_space<vmem>>, vector<1x16x128xf32>,
    return
  }
  func.func @transform_0(%arg0: i32, %arg1: memref<2xi32, #tpu.memory_space<smem>>) -> (i32, i32, i32) {
    %c0_i32 = arith.constant 0 : i32
    %c0_i32_0 = arith.constant 0 : i32
    %c0_i32_1 = arith.constant 0 : i32
    return %arg0, %c0_i32, %c0_i32_0 : i32, i32, i32
  }
  func.func @transform_1(%arg0: i32, %arg1: memref<2xi32, #tpu.memory_space<smem>>) -> (i32, i32, i32) {
    %c0_i32 = arith.constant 0 : i32
    %c0_i32_0 = arith.constant 0 : i32
    %c0_i32_1 = arith.constant 0 : i32
    %c0_i32_2 = arith.constant 0 : i32
    return %c0_i32, %c0_i32_0, %c0_i32_1 : i32, i32, i32
  }
  func.func @transform_2(%arg0: i32, %arg1: memref<2xi32, #tpu.memory_space<smem>>) -> (i32, i32) {
    %c0_i32 = arith.constant 0 : i32
    %c0_i32_0 = arith.constant 0 : i32
    %c0_i32_1 = arith.constant 0 : i32
    return %c0_i32, %c0_i32_0 : i32, i32
  }
  func.func @transform_3(%arg0: i32, %arg1: memref<2xi32, #tpu.memory_space<smem>>) -> (i32, i32, i32) {
    %c0_i32 = arith.constant 0 : i32
    %c0_i32_0 = arith.constant 0 : i32
    %c0_i32_1 = arith.constant 0 : i32
    %c0_i32_2 = arith.constant 0 : i32
    return %c0_i32, %c0_i32_0, %c0_i32_1 : i32, i32, i32
  }
  func.func @transform_4(%arg0: i32, %arg1: memref<2xi32, #tpu.memory_space<smem>>) -> (i32, i32) {
    %c0_i32 = arith.constant 0 : i32
    %c0_i32_0 = arith.constant 0 : i32
    %c0_i32_1 = arith.constant 0 : i32
    return %c0_i32, %c0_i32_0 : i32, i32
  }
  func.func @transform_5(%arg0: i32, %arg1: memref<2xi32, #tpu.memory_space<smem>>) -> (i32, i32, i32) {
    %c0_i32 = arith.constant 0 : i32
    %c0_i32_0 = arith.constant 0 : i32
    %c0_i32_1 = arith.constant 0 : i32
    %c0_i32_2 = arith.constant 0 : i32
    return %c0_i32, %c0_i32_0, %c0_i32_1 : i32, i32, i32
  }
  func.func @transform_6(%arg0: i32, %arg1: memref<2xi32, #tpu.memory_space<smem>>) -> (i32, i32) {
    %c0_i32 = arith.constant 0 : i32
    %c0_i32_0 = arith.constant 0 : i32
    %c0_i32_1 = arith.constant 0 : i32
    return %c0_i32, %c0_i32_0 : i32, i32
  }
  func.func @transform_7(%arg0: i32, %arg1: memref<2xi32, #tpu.memory_space<smem>>) -> (i32, i32, i32) {
    %c0_i32 = arith.constant 0 : i32
    %c0_i32_0 = arith.constant 0 : i32
    %c0_i32_1 = arith.constant 0 : i32
    return %arg0, %c0_i32, %c0_i32_0 : i32, i32, i32
  }
}

module attributes {stable_mosaic.version = 11 : i64} {
  func.func @_cls_head_kernel(%arg0: i32, %arg1: memref<2xi32, #tpu.memory_space<smem>>, %arg2: memref<1x16x128xbf16, #tpu.memory_space<vmem>>, %arg3: memref<3x128x128xbf16, #tpu.memory_space<vmem>>, %arg4: memref<1x128xf32, #tpu.memory_space<vmem>>, %arg5: memref<3x128x128xbf16, #tpu.memory_space<vmem>>, %arg6: memref<1x128xf32, #tpu.memory_space<vmem>>, %arg7: memref<3x128x128xbf16, #tpu.memory_space<vmem>>, %arg8: memref<1x128xf32, #tpu.memory_space<vmem>>, %arg9: memref<1x16x128xf32, #tpu.memory_space<vmem>>) attributes {dimension_semantics = [#tpu.dimension_semantics<parallel>], iteration_bounds = array<i64: 2>, scalar_prefetch = 1 : i64, scratch_operands = 0 : i64, tpu.core_type = #tpu.core_type<tc>, window_params = [{transform_indices = @transform_0, window_bounds = array<i64: 1, 16, 128>}, {pipeline_mode = #tpu.pipeline_mode<synchronous>, transform_indices = @transform_1, window_bounds = array<i64: 3, 128, 128>}, {pipeline_mode = #tpu.pipeline_mode<synchronous>, transform_indices = @transform_2, window_bounds = array<i64: 1, 128>}, {pipeline_mode = #tpu.pipeline_mode<synchronous>, transform_indices = @transform_3, window_bounds = array<i64: 3, 128, 128>}, {pipeline_mode = #tpu.pipeline_mode<synchronous>, transform_indices = @transform_4, window_bounds = array<i64: 1, 128>}, {pipeline_mode = #tpu.pipeline_mode<synchronous>, transform_indices = @transform_5, window_bounds = array<i64: 3, 128, 128>}, {pipeline_mode = #tpu.pipeline_mode<synchronous>, transform_indices = @transform_6, window_bounds = array<i64: 1, 128>}, {transform_indices = @transform_7, window_bounds = array<i64: 1, 16, 128>}]} {
    %0 = arith.index_cast %arg0 : i32 to index
    %1 = memref.load %arg1[%0] : memref<2xi32, #tpu.memory_space<smem>>
    %c0 = arith.constant 0 : index
    %c0_0 = arith.constant 0 : index
    %c0_1 = arith.constant 0 : index
    %2 = vector.load %arg2[%c0, %c0_0, %c0_1] : memref<1x16x128xbf16, #tpu.memory_space<vmem>>, vector<1x16x128xbf16>
    %3 = vector.shape_cast %2 : vector<1x16x128xbf16> to vector<16x128xbf16>
    %4 = tpu.iota {dimensions = array<i32: 0>} : vector<16x1xi32>
    %c0_i32 = arith.constant 0 : i32
    %5 = vector.broadcast %c0_i32 : i32 to vector<16x1xi32>
    %6 = arith.cmpi sgt, %4, %5 : vector<16x1xi32>
    %c15_i32 = arith.constant 15 : i32
    %7 = vector.broadcast %c15_i32 : i32 to vector<16x1xi32>
    %8 = arith.cmpi slt, %4, %7 : vector<16x1xi32>
    %9 = vector.broadcast %1 : i32 to vector<16x1xi32>
    %10 = arith.cmpi slt, %4, %9 : vector<16x1xi32>
    %11 = arith.extui %10 : vector<16x1xi1> to vector<16x1xi32>
    %12 = arith.sitofp %11 : vector<16x1xi32> to vector<16x1xf32>
    %c0_2 = arith.constant 0 : index
    %c0_3 = arith.constant 0 : index
    %c0_4 = arith.constant 0 : index
    %13 = vector.load %arg3[%c0_2, %c0_3, %c0_4] : memref<3x128x128xbf16, #tpu.memory_space<vmem>>, vector<1x128x128xbf16>
    %14 = vector.shape_cast %13 : vector<1x128x128xbf16> to vector<128x128xbf16>
    %cst = arith.constant dense<0.000000e+00> : vector<16x128xf32>
    %15 = tpu.matmul %3, %14, %cst {dimension_numbers = #tpu.dot_dimension_numbers<[1], [0], [0], [1], [0, 0, 1, 1], [], []>} : vector<16x128xbf16>, vector<128x128xbf16>, vector<16x128xf32> -> vector<16x128xf32>
    %c1 = arith.constant 1 : index
    %c0_5 = arith.constant 0 : index
    %c0_6 = arith.constant 0 : index
    %16 = vector.load %arg3[%c1, %c0_5, %c0_6] : memref<3x128x128xbf16, #tpu.memory_space<vmem>>, vector<1x128x128xbf16>
    %17 = vector.shape_cast %16 : vector<1x128x128xbf16> to vector<128x128xbf16>
    %cst_7 = arith.constant dense<0.000000e+00> : vector<16x128xf32>
    %18 = tpu.matmul %3, %17, %cst_7 {dimension_numbers = #tpu.dot_dimension_numbers<[1], [0], [0], [1], [0, 0, 1, 1], [], []>} : vector<16x128xbf16>, vector<128x128xbf16>, vector<16x128xf32> -> vector<16x128xf32>
    %c2 = arith.constant 2 : index
    %c0_8 = arith.constant 0 : index
    %c0_9 = arith.constant 0 : index
    %19 = vector.load %arg3[%c2, %c0_8, %c0_9] : memref<3x128x128xbf16, #tpu.memory_space<vmem>>, vector<1x128x128xbf16>
    %20 = vector.shape_cast %19 : vector<1x128x128xbf16> to vector<128x128xbf16>
    %cst_10 = arith.constant dense<0.000000e+00> : vector<16x128xf32>
    %21 = tpu.matmul %3, %20, %cst_10 {dimension_numbers = #tpu.dot_dimension_numbers<[1], [0], [0], [1], [0, 0, 1, 1], [], []>} : vector<16x128xbf16>, vector<128x128xbf16>, vector<16x128xf32> -> vector<16x128xf32>
    %c1_i32 = arith.constant 1 : i32
    %22 = tpu.dynamic_rotate %15 by %c1_i32 dim 0 : vector<16x128xf32>, i32 -> vector<16x128xf32>
    %cst_11 = arith.constant 0.000000e+00 : f32
    %23 = vector.shape_cast %6 : vector<16x1xi1> to vector<16x1xi1>
    %24 = vector.broadcast %23 : vector<16x1xi1> to vector<16x128xi1>
    %25 = vector.broadcast %cst_11 : f32 to vector<16x128xf32>
    %26 = arith.select %24, %22, %25 : vector<16x128xi1>, vector<16x128xf32>
    %c15_i32_12 = arith.constant 15 : i32
    %27 = tpu.dynamic_rotate %21 by %c15_i32_12 dim 0 : vector<16x128xf32>, i32 -> vector<16x128xf32>
    %cst_13 = arith.constant 0.000000e+00 : f32
    %28 = vector.shape_cast %8 : vector<16x1xi1> to vector<16x1xi1>
    %29 = vector.broadcast %28 : vector<16x1xi1> to vector<16x128xi1>
    %30 = vector.broadcast %cst_13 : f32 to vector<16x128xf32>
    %31 = arith.select %29, %27, %30 : vector<16x128xi1>, vector<16x128xf32>
    %32 = arith.addf %26, %18 : vector<16x128xf32>
    %33 = arith.addf %32, %31 : vector<16x128xf32>
    %c0_14 = arith.constant 0 : index
    %c0_15 = arith.constant 0 : index
    %34 = vector.load %arg4[%c0_14, %c0_15] : memref<1x128xf32, #tpu.memory_space<vmem>>, vector<1x128xf32>
    %35 = vector.broadcast %34 : vector<1x128xf32> to vector<16x128xf32>
    %36 = arith.addf %33, %35 : vector<16x128xf32>
    %37 = vector.broadcast %12 : vector<16x1xf32> to vector<16x128xf32>
    %38 = arith.mulf %36, %37 : vector<16x128xf32>
    %cst_16 = arith.constant 0.000000e+00 : f32
    %39 = vector.broadcast %cst_16 : f32 to vector<16x128xf32>
    %40 = arith.maximumf %38, %39 : vector<16x128xf32>
    %41 = arith.truncf %40 : vector<16x128xf32> to vector<16x128xbf16>
    %c0_17 = arith.constant 0 : index
    %c0_18 = arith.constant 0 : index
    %c0_19 = arith.constant 0 : index
    %42 = vector.load %arg5[%c0_17, %c0_18, %c0_19] : memref<3x128x128xbf16, #tpu.memory_space<vmem>>, vector<1x128x128xbf16>
    %43 = vector.shape_cast %42 : vector<1x128x128xbf16> to vector<128x128xbf16>
    %cst_20 = arith.constant dense<0.000000e+00> : vector<16x128xf32>
    %44 = tpu.matmul %41, %43, %cst_20 {dimension_numbers = #tpu.dot_dimension_numbers<[1], [0], [0], [1], [0, 0, 1, 1], [], []>} : vector<16x128xbf16>, vector<128x128xbf16>, vector<16x128xf32> -> vector<16x128xf32>
    %c1_21 = arith.constant 1 : index
    %c0_22 = arith.constant 0 : index
    %c0_23 = arith.constant 0 : index
    %45 = vector.load %arg5[%c1_21, %c0_22, %c0_23] : memref<3x128x128xbf16, #tpu.memory_space<vmem>>, vector<1x128x128xbf16>
    %46 = vector.shape_cast %45 : vector<1x128x128xbf16> to vector<128x128xbf16>
    %cst_24 = arith.constant dense<0.000000e+00> : vector<16x128xf32>
    %47 = tpu.matmul %41, %46, %cst_24 {dimension_numbers = #tpu.dot_dimension_numbers<[1], [0], [0], [1], [0, 0, 1, 1], [], []>} : vector<16x128xbf16>, vector<128x128xbf16>, vector<16x128xf32> -> vector<16x128xf32>
    %c2_25 = arith.constant 2 : index
    %c0_26 = arith.constant 0 : index
    %c0_27 = arith.constant 0 : index
    %48 = vector.load %arg5[%c2_25, %c0_26, %c0_27] : memref<3x128x128xbf16, #tpu.memory_space<vmem>>, vector<1x128x128xbf16>
    %49 = vector.shape_cast %48 : vector<1x128x128xbf16> to vector<128x128xbf16>
    %cst_28 = arith.constant dense<0.000000e+00> : vector<16x128xf32>
    %50 = tpu.matmul %41, %49, %cst_28 {dimension_numbers = #tpu.dot_dimension_numbers<[1], [0], [0], [1], [0, 0, 1, 1], [], []>} : vector<16x128xbf16>, vector<128x128xbf16>, vector<16x128xf32> -> vector<16x128xf32>
    %c1_i32_29 = arith.constant 1 : i32
    %51 = tpu.dynamic_rotate %44 by %c1_i32_29 dim 0 : vector<16x128xf32>, i32 -> vector<16x128xf32>
    %cst_30 = arith.constant 0.000000e+00 : f32
    %52 = vector.shape_cast %6 : vector<16x1xi1> to vector<16x1xi1>
    %53 = vector.broadcast %52 : vector<16x1xi1> to vector<16x128xi1>
    %54 = vector.broadcast %cst_30 : f32 to vector<16x128xf32>
    %55 = arith.select %53, %51, %54 : vector<16x128xi1>, vector<16x128xf32>
    %c15_i32_31 = arith.constant 15 : i32
    %56 = tpu.dynamic_rotate %50 by %c15_i32_31 dim 0 : vector<16x128xf32>, i32 -> vector<16x128xf32>
    %cst_32 = arith.constant 0.000000e+00 : f32
    %57 = vector.shape_cast %8 : vector<16x1xi1> to vector<16x1xi1>
    %58 = vector.broadcast %57 : vector<16x1xi1> to vector<16x128xi1>
    %59 = vector.broadcast %cst_32 : f32 to vector<16x128xf32>
    %60 = arith.select %58, %56, %59 : vector<16x128xi1>, vector<16x128xf32>
    %61 = arith.addf %55, %47 : vector<16x128xf32>
    %62 = arith.addf %61, %60 : vector<16x128xf32>
    %c0_33 = arith.constant 0 : index
    %c0_34 = arith.constant 0 : index
    %63 = vector.load %arg6[%c0_33, %c0_34] : memref<1x128xf32, #tpu.memory_space<vmem>>, vector<1x128xf32>
    %64 = vector.broadcast %63 : vector<1x128xf32> to vector<16x128xf32>
    %65 = arith.addf %62, %64 : vector<16x128xf32>
    %66 = vector.broadcast %12 : vector<16x1xf32> to vector<16x128xf32>
    %67 = arith.mulf %65, %66 : vector<16x128xf32>
    %cst_35 = arith.constant 0.000000e+00 : f32
    %68 = vector.broadcast %cst_35 : f32 to vector<16x128xf32>
    %69 = arith.maximumf %67, %68 : vector<16x128xf32>
    %70 = arith.truncf %69 : vector<16x128xf32> to vector<16x128xbf16>
    %c0_36 = arith.constant 0 : index
    %c0_37 = arith.constant 0 : index
    %c0_38 = arith.constant 0 : index
    %71 = vector.load %arg7[%c0_36, %c0_37, %c0_38] : memref<3x128x128xbf16, #tpu.memory_space<vmem>>, vector<1x128x128xbf16>
    %72 = vector.shape_cast %71 : vector<1x128x128xbf16> to vector<128x128xbf16>
    %cst_39 = arith.constant dense<0.000000e+00> : vector<16x128xf32>
    %73 = tpu.matmul %70, %72, %cst_39 {dimension_numbers = #tpu.dot_dimension_numbers<[1], [0], [0], [1], [0, 0, 1, 1], [], []>} : vector<16x128xbf16>, vector<128x128xbf16>, vector<16x128xf32> -> vector<16x128xf32>
    %c1_40 = arith.constant 1 : index
    %c0_41 = arith.constant 0 : index
    %c0_42 = arith.constant 0 : index
    %74 = vector.load %arg7[%c1_40, %c0_41, %c0_42] : memref<3x128x128xbf16, #tpu.memory_space<vmem>>, vector<1x128x128xbf16>
    %75 = vector.shape_cast %74 : vector<1x128x128xbf16> to vector<128x128xbf16>
    %cst_43 = arith.constant dense<0.000000e+00> : vector<16x128xf32>
    %76 = tpu.matmul %70, %75, %cst_43 {dimension_numbers = #tpu.dot_dimension_numbers<[1], [0], [0], [1], [0, 0, 1, 1], [], []>} : vector<16x128xbf16>, vector<128x128xbf16>, vector<16x128xf32> -> vector<16x128xf32>
    %c2_44 = arith.constant 2 : index
    %c0_45 = arith.constant 0 : index
    %c0_46 = arith.constant 0 : index
    %77 = vector.load %arg7[%c2_44, %c0_45, %c0_46] : memref<3x128x128xbf16, #tpu.memory_space<vmem>>, vector<1x128x128xbf16>
    %78 = vector.shape_cast %77 : vector<1x128x128xbf16> to vector<128x128xbf16>
    %cst_47 = arith.constant dense<0.000000e+00> : vector<16x128xf32>
    %79 = tpu.matmul %70, %78, %cst_47 {dimension_numbers = #tpu.dot_dimension_numbers<[1], [0], [0], [1], [0, 0, 1, 1], [], []>} : vector<16x128xbf16>, vector<128x128xbf16>, vector<16x128xf32> -> vector<16x128xf32>
    %c1_i32_48 = arith.constant 1 : i32
    %80 = tpu.dynamic_rotate %73 by %c1_i32_48 dim 0 : vector<16x128xf32>, i32 -> vector<16x128xf32>
    %cst_49 = arith.constant 0.000000e+00 : f32
    %81 = vector.shape_cast %6 : vector<16x1xi1> to vector<16x1xi1>
    %82 = vector.broadcast %81 : vector<16x1xi1> to vector<16x128xi1>
    %83 = vector.broadcast %cst_49 : f32 to vector<16x128xf32>
    %84 = arith.select %82, %80, %83 : vector<16x128xi1>, vector<16x128xf32>
    %c15_i32_50 = arith.constant 15 : i32
    %85 = tpu.dynamic_rotate %79 by %c15_i32_50 dim 0 : vector<16x128xf32>, i32 -> vector<16x128xf32>
    %cst_51 = arith.constant 0.000000e+00 : f32
    %86 = vector.shape_cast %8 : vector<16x1xi1> to vector<16x1xi1>
    %87 = vector.broadcast %86 : vector<16x1xi1> to vector<16x128xi1>
    %88 = vector.broadcast %cst_51 : f32 to vector<16x128xf32>
    %89 = arith.select %87, %85, %88 : vector<16x128xi1>, vector<16x128xf32>
    %90 = arith.addf %84, %76 : vector<16x128xf32>
    %91 = arith.addf %90, %89 : vector<16x128xf32>
    %c0_52 = arith.constant 0 : index
    %c0_53 = arith.constant 0 : index
    %92 = vector.load %arg8[%c0_52, %c0_53] : memref<1x128xf32, #tpu.memory_space<vmem>>, vector<1x128xf32>
    %93 = vector.broadcast %92 : vector<1x128xf32> to vector<16x128xf32>
    %94 = arith.addf %91, %93 : vector<16x128xf32>
    %95 = vector.broadcast %12 : vector<16x1xf32> to vector<16x128xf32>
    %96 = arith.mulf %94, %95 : vector<16x128xf32>
    %c0_54 = arith.constant 0 : index
    %c0_55 = arith.constant 0 : index
    %c0_56 = arith.constant 0 : index
    %97 = vector.load %arg9[%c0_54, %c0_55, %c0_56] : memref<1x16x128xf32, #tpu.memory_space<vmem>>, vector<1x16x128xf32>
    %98 = vector.shape_cast %97 : vector<1x16x128xf32> to vector<16x128xf32>
    %99 = vector.shape_cast %96 : vector<16x128xf32> to vector<1x16x128xf32>
    tpu.vector_store %arg9[%c0_54, %c0_55, %c0_56], %99 {strides = array<i32>} : memref<1x16x128xf32, #tpu.memory_space<vmem>>, vector<1x16x128xf32>,
    return
  }
  func.func @transform_0(%arg0: i32, %arg1: memref<2xi32, #tpu.memory_space<smem>>) -> (i32, i32, i32) {
    %c0_i32 = arith.constant 0 : i32
    %c0_i32_0 = arith.constant 0 : i32
    %c0_i32_1 = arith.constant 0 : i32
    return %arg0, %c0_i32, %c0_i32_0 : i32, i32, i32
  }
  func.func @transform_1(%arg0: i32, %arg1: memref<2xi32, #tpu.memory_space<smem>>) -> (i32, i32, i32) {
    %c0_i32 = arith.constant 0 : i32
    %c0_i32_0 = arith.constant 0 : i32
    %c0_i32_1 = arith.constant 0 : i32
    %c0_i32_2 = arith.constant 0 : i32
    return %c0_i32, %c0_i32_0, %c0_i32_1 : i32, i32, i32
  }
  func.func @transform_2(%arg0: i32, %arg1: memref<2xi32, #tpu.memory_space<smem>>) -> (i32, i32) {
    %c0_i32 = arith.constant 0 : i32
    %c0_i32_0 = arith.constant 0 : i32
    %c0_i32_1 = arith.constant 0 : i32
    return %c0_i32, %c0_i32_0 : i32, i32
  }
  func.func @transform_3(%arg0: i32, %arg1: memref<2xi32, #tpu.memory_space<smem>>) -> (i32, i32, i32) {
    %c0_i32 = arith.constant 0 : i32
    %c0_i32_0 = arith.constant 0 : i32
    %c0_i32_1 = arith.constant 0 : i32
    %c0_i32_2 = arith.constant 0 : i32
    return %c0_i32, %c0_i32_0, %c0_i32_1 : i32, i32, i32
  }
  func.func @transform_4(%arg0: i32, %arg1: memref<2xi32, #tpu.memory_space<smem>>) -> (i32, i32) {
    %c0_i32 = arith.constant 0 : i32
    %c0_i32_0 = arith.constant 0 : i32
    %c0_i32_1 = arith.constant 0 : i32
    return %c0_i32, %c0_i32_0 : i32, i32
  }
  func.func @transform_5(%arg0: i32, %arg1: memref<2xi32, #tpu.memory_space<smem>>) -> (i32, i32, i32) {
    %c0_i32 = arith.constant 0 : i32
    %c0_i32_0 = arith.constant 0 : i32
    %c0_i32_1 = arith.constant 0 : i32
    %c0_i32_2 = arith.constant 0 : i32
    return %c0_i32, %c0_i32_0, %c0_i32_1 : i32, i32, i32
  }
  func.func @transform_6(%arg0: i32, %arg1: memref<2xi32, #tpu.memory_space<smem>>) -> (i32, i32) {
    %c0_i32 = arith.constant 0 : i32
    %c0_i32_0 = arith.constant 0 : i32
    %c0_i32_1 = arith.constant 0 : i32
    return %c0_i32, %c0_i32_0 : i32, i32
  }
  func.func @transform_7(%arg0: i32, %arg1: memref<2xi32, #tpu.memory_space<smem>>) -> (i32, i32, i32) {
    %c0_i32 = arith.constant 0 : i32
    %c0_i32_0 = arith.constant 0 : i32
    %c0_i32_1 = arith.constant 0 : i32
    return %arg0, %c0_i32, %c0_i32_0 : i32, i32, i32
  }
}

</mosaic_0001>

<bundles_post_ra>
// kernel: tpu_custom_call.1
= control target key start
LH: loop header
LB: loop body
LE: loop exit
PB: predicated region body
PF: predicated region fallthrough
CT: control target
= control target key end

     0   :  { %s2759_s0 = inlined_call_operand.hbm [shape: s32[2], index: 0, kind: input, shape index: {}]   ;;  %s2760_s1 = inlined_call_operand.hbm [shape: bf16[2,16,128], index: 1, kind: input, shape index: {}]   ;;  %s2761_s2 = inlined_call_operand.hbm [shape: bf16[3,128,128], index: 2, kind: input, shape index: {}]   ;;  %s2762_s3 = inlined_call_operand.vmem [shape: f32[1,128], index: 3, kind: input, shape index: {}]   ;;  %s2763_s4 = inlined_call_operand.hbm [shape: bf16[3,128,128], index: 4, kind: input, shape index: {}]   ;;  %s2764_s5 = inlined_call_operand.vmem [shape: f32[1,128], index: 5, kind: input, shape index: {}]   ;;  %s2765_s6 = inlined_call_operand.hbm [shape: bf16[3,128,128], index: 6, kind: input, shape index: {}]   ;;  %s2766_s7 = inlined_call_operand.vmem [shape: f32[1,128], index: 7, kind: input, shape index: {}]   ;;  %s2767_s8 = inlined_call_operand.hbm [shape: f32[2,16,128], index: 8, kind: output, shape index: {}]  }
   0x1   :  { %s2054_s29 = scalar_lea.hbm %s2759_s0, 16 }
   0x2   :  { %p2055_p0 = scmp.ne.s32.totalorder %s2759_s0, %s2054_s29  ;;  %p2058_p1 = scmp.lt.u32.totalorder %s2054_s29, %s2759_s0 }
   0x4   :  { %p2060_p2 = pnand %p2058_p1, %p2055_p0 }
   0x6   :  { %2063 = shalt.err (!%p2060_p2)  }
   0x7   :  { %s2256_s12 = smov [#allocation3]  }
   0x8   :  { %14 = dma.hbm_to_smem %s2759_s0, 16, %s2256_s12, [#allocation2] }
   0x9   :  { %2222 = dma.done.wait [#allocation2], 16 }
   0xa   :  { %2223 = vsyncadd [#allocation2], 4294967280 }
   0xb   :  { %16 = sfence }
   0xc   :  { %17 = vsyncpa [#allocation5], 0 }
   0xd   :  { %19 = vsyncpa [#allocation5 + $0x1], 0 }
   0xe   :  { %20 = vsyncpa [#allocation8], 0 }
   0xf   :  { %21 = vsyncpa [#allocation11], 0 }
  0x10   :  { %22 = vsyncpa [#allocation6], 0 }
  0x11   :  { %24 = vsyncpa [#allocation6 + $0x1], 0  ;;  %s2325_s15 = smov 0   ;;  %s2327_s16 = smov 0  }
  0x12   :  { %s2329_s17 = smov 0   ;;  %s2331_s18 = smov 0  }
  0x13 LB: > { %s2346_s0 = sadd.s32 4294967295, %s2254_s18   ;;  %s1536_s19 = sadd.s32 4294967294, %s2254_s18   ;;  %s2254_s18 = sphi %s2331_s18, %s2793_s18   ;;  %s2250_s17 = sphi %s2329_s17, %s2792_s17   ;;  %s2246_s16 = sphi %s2327_s16, %s2791_s16   ;;  %s2242_s15 = sphi %s2325_s15, %s2790_s15  }
  0x14   : > { %p50_p3 = scmp.ne.s32.totalorder %s2246_s16, %s2242_s15  ;;  %p2768_p4 = scmp.eq.s32.totalorder %s2346_s0, 0 }
  0x15   : > { %p206_p6 = scmp.eq.s32.totalorder %s1536_s19, 1  ;;  %p1537_p8 = scmp.ge.s32.totalorder %s2254_s18, 1 }
  0x16   : > { %p2355_p7 = por %p2768_p4, %p50_p3  ;;  %p213_p10 = scmp.lt.s32.totalorder %s2254_s18, 3 }
  0x17   : > { %p2360_p9 = por %p206_p6, %p50_p3  ;;  %s2257_s23 = smov [#allocation7]  }
  0x18   : > { %s2772_s20 = scalar_select %p2355_p7, 1, 0 }
  0x19   : > { %s2773_s21 = scalar_select %p2360_p9, 1, 0 }
  0x1a   : > { %p2365_p11 = pnand %p1537_p8, %p213_p10  ;;  %s225_s24 = sshll.u32 %s2257_s23, 4  ;;  %s2369_s24 = int_to_ptr.vmem [resolvable:$true] %s225_s24 }
  0x1b   : > { %2774 = sst [smem:[#allocation18_spill]] %s2773_s21  ;;  %s2258_s26 = smov [#allocation9]  }
  0x1c   : > { %s2775_s22 = scalar_select %p2365_p11, 1, 0 }
  0x1d   : > { %p1913_p12 = pneg %p2365_p11  ;;  %s241_s27 = sshll.u32 %s2258_s26, 4  ;;  %s2380_s27 = int_to_ptr.vmem [resolvable:$true] %s241_s27 }
  0x1e   : > { %s2259_s28 = smov [#allocation10]   ;;  %s2064_s10 = scalar_lea.hbm %s2761_s2, 3072 }
  0x1f   : > { %p2376_p0 = pnand %p1913_p12, %p2768_p4  ;;  %s2382_s29 = sshll.u32 %s2259_s28, 4  ;;  %s258_s29 = int_to_ptr.vmem [resolvable:$true] %s2382_s29 }
  0x20   : > { %p2065_p1 = scmp.ne.s32.totalorder %s2761_s2, %s2064_s10  ;;  %p2071_p8 = scmp.lt.u32.totalorder %s2064_s10, %s2761_s2 }
  0x21   : > { %p2392_p2 = pneg %p2376_p0 }
  0x23   : > { %p2067_p3 = pnand %p2392_p2, %p2065_p1 }
  0x25   : > { %p2068_p6 = pneg %p2067_p3 }
  0x27   : > { %p2073_p10 = pnand %p2071_p8, %p2068_p6 }
  0x29   : > { %2076 = shalt.err (!%p2073_p10)
}
  0x2a   : > { %s2077_s23 = scalar_lea.vmem %s2369_s24, 3072  ;;  %p2085_p5 = scmp.lt.s32.totalorder %s2369_s24, %s2369_s24 }
  0x2b   : > { %p2078_p12 = scmp.ne.s32.totalorder %s2369_s24, %s2077_s23  ;;  %p2086_p9 = scmp.lt.s32.totalorder %s2077_s23, %s2077_s23 }
  0x2d   : > { %p2080_p13 = pnand %p2078_p12, %p2392_p2  ;;  %p2087_p1 = por %p2086_p9, %p2085_p5 }
  0x2f   : > { %p2081_p4 = pneg %p2080_p13 }
  0x31   : > { %p2088_p3 = pnand %p2087_p1, %p2081_p4 }
  0x33   : > { %2091 = shalt.err (!%p2088_p3)
}
  0x34   : > { %s2260_s26 = smov 64   ;;  %s2261_s28 = smov 4  }
  0x35   : > { %1916 = dma.hbm_to_vmem [thread:$0]  (!%p2376_p0), %s2761_s2, 3072, %s2369_s24, [#allocation8], %s2260_s26, %s2260_s26, %s2261_s28  }
  0x36   : > { %s2092_s12 = scalar_lea.hbm %s2763_s4, 3072 }
  0x37   : > { %p2093_p4 = scmp.ne.s32.totalorder %s2763_s4, %s2092_s12  ;;  %p2099_p13 = scmp.lt.u32.totalorder %s2092_s12, %s2763_s4 }
  0x39   : > { %p2095_p5 = pnand %p2093_p4, %p2392_p2 }
  0x3b   : > { %p2096_p9 = pneg %p2095_p5 }
  0x3d   : > { %p2101_p6 = pnand %p2099_p13, %p2096_p9 }
  0x3f   : > { %2104 = shalt.err (!%p2101_p6)
}
  0x40   : > { %s2105_s24 = scalar_lea.vmem %s2380_s27, 3072  ;;  %p2113_p1 = scmp.lt.s32.totalorder %s2380_s27, %s2380_s27 }
  0x41   : > { %p2106_p8 = scmp.ne.s32.totalorder %s2380_s27, %s2105_s24  ;;  %p2114_p3 = scmp.lt.s32.totalorder %s2105_s24, %s2105_s24 }
  0x43   : > { %p2108_p10 = pnand %p2106_p8, %p2392_p2  ;;  %p2115_p4 = por %p2114_p3, %p2113_p1 }
  0x45   : > { %p2109_p12 = pneg %p2108_p10 }
  0x47   : > { %p2116_p5 = pnand %p2115_p4, %p2109_p12 }
  0x49   : > { %2119 = shalt.err (!%p2116_p5)
}
  0x4a   : > { %1919 = dma.hbm_to_vmem [thread:$0]  (!%p2376_p0), %s2763_s4, 3072, %s2380_s27, [#allocation8], %s2260_s26, %s2260_s26, %s2261_s28  }
  0x4b   : > { %s2120_s11 = scalar_lea.hbm %s2765_s6, 3072 }
  0x4c   : > { %p2121_p9 = scmp.ne.s32.totalorder %s2765_s6, %s2120_s11  ;;  %p2127_p8 = scmp.lt.u32.totalorder %s2120_s11, %s2765_s6 }
  0x4e   : > { %p2123_p13 = pnand %p2121_p9, %p2392_p2 }
  0x50   : > { %p2124_p6 = pneg %p2123_p13 }
  0x52   : > { %p2129_p10 = pnand %p2127_p8, %p2124_p6 }
  0x54   : > { %2132 = shalt.err (!%p2129_p10)
}
  0x55   : > { %s2133_s24 = scalar_lea.vmem %s258_s29, 3072  ;;  %p2141_p4 = scmp.lt.s32.totalorder %s258_s29, %s258_s29 }
  0x56   : > { %p2134_p12 = scmp.ne.s32.totalorder %s258_s29, %s2133_s24  ;;  %p2142_p5 = scmp.lt.s32.totalorder %s2133_s24, %s2133_s24 }
  0x58   : > { %p2136_p1 = pnand %p2134_p12, %p2392_p2  ;;  %p2143_p7 = por %p2142_p5, %p2141_p4 }
  0x5a   : > { %p2137_p3 = pneg %p2136_p1 }
  0x5c   : > { %p2144_p11 = pnand %p2143_p7, %p2137_p3 }
  0x5e   : > { %2147 = shalt.err (!%p2144_p11)
}
  0x5f   : > { %1922 = dma.hbm_to_vmem [thread:$0]  (!%p2376_p0), %s2765_s6, 3072, %s258_s29, [#allocation11], %s2260_s26, %s2260_s26, %s2261_s28  }
  0x60   : > { %s2465_s13 = sadd.s32 1, %s2254_s18   ;;  %s37_s30 = sadd.s32 1, %s2250_s17 }
  0x61   : > { %s34_s25 = ssub.s32 %s2254_s18, %s2465_s13  ;;  %p44_p11 = scmp.ne.s32.totalorder %s2250_s17, %s2246_s16 }
  0x62   : > { %p35_p7 = scmp.eq.s32.totalorder %s34_s25, 0  ;;  %p45_p2 = scmp.eq.s32.totalorder %s2254_s18, 0 }
  0x63   : > { %p1934_p9 = scmp.lt.s32.totalorder %s2254_s18, 2  ;;  %p2778_p6 = scmp.eq.s32.totalorder %s2346_s0, 1 }
  0x64   : > { %s2475_s9 = scalar_select %p35_p7, %s2250_s17, %s37_s30  }
  0x65   : > { %p46_p13 = por %p45_p2, %p44_p11  ;;  %p2479_p8 = por %p2778_p6, %p44_p11 }
  0x66   : > { %s274_s11 = sand.u32 1, %s2250_s17   ;;  %s1634_s12 = sshll.u32 %s2254_s18, 7 }
  0x67   : > { %s1542_s29 = sshll.u32 %s274_s11, 3  ;;  %s2488_s23 = scalar_lea.hbm %s2760_s1, %s1634_s12 }
  0x68   : > { %s278_s24 = scalar_lea.vmem [#allocation4], %s1542_s29  ;;  %p2490_p0 = pnand %p1934_p9, %p46_p13 }
  0x69   : > { %s285_s27 = sshll.u32 %s278_s24, 4  ;;  %s2496_s25 = scalar_lea.sflag [#allocation5], %s274_s11  ;;  %s2494_s27 = int_to_ptr.vmem [resolvable:$true] %s285_s27 }
  0x6a   : > { %s2148_s30 = scalar_lea.hbm %s2488_s23, 128  ;;  %p2150_p12 = pneg %p2490_p0 }
  0x6b   : > { %p2149_p10 = scmp.ne.s32.totalorder %s2488_s23, %s2148_s30  ;;  %s2153_s14 = scalar_lea.hbm %s2760_s1, 256 }
  0x6c   : > { %p2154_p4 = scmp.lt.u32.totalorder %s2488_s23, %s2760_s1  ;;  %p2155_p5 = scmp.lt.u32.totalorder %s2153_s14, %s2148_s30 }
  0x6d   : > { %p2151_p1 = pnand %p2150_p12, %p2149_p10  ;;  %p2157_p11 = scmp.lt.u32.totalorder %s2148_s30, %s2488_s23 }
  0x6e   : > { %p2156_p7 = por %p2155_p5, %p2154_p4 }
  0x6f   : > { %p2152_p3 = pneg %p2151_p1 }
  0x70   : > { %p2158_p2 = por %p2157_p11, %p2156_p7 }
  0x72   : > { %p2159_p9 = pnand %p2158_p2, %p2152_p3 }
  0x74   : > { %2162 = shalt.err (!%p2159_p9)
}
  0x75   : > { %s2163_s11 = scalar_lea.vmem %s2494_s27, 128  ;;  %s2262_s12 = smov [#allocation4]  }
  0x76   : > { %p2164_p13 = scmp.ne.s32.totalorder %s2494_s27, %s2163_s11  ;;  %s2168_s29 = sshll.u32 %s2262_s12, 4  ;;  %s2169_s29 = int_to_ptr.vmem [resolvable:$false] %s2168_s29 }
  0x77   : > { %s2170_s19 = scalar_lea.vmem %s2169_s29, 256  ;;  %p2171_p1 = scmp.lt.s32.totalorder %s2494_s27, %s2169_s29 }
  0x78   : > { %p2166_p6 = pnand %p2164_p13, %p2150_p12  ;;  %p2172_p4 = scmp.lt.s32.totalorder %s2170_s19, %s2163_s11 }
  0x7a   : > { %p2167_p10 = pneg %p2166_p6  ;;  %p2173_p5 = por %p2172_p4, %p2171_p1 }
  0x7c   : > { %p2174_p7 = pnand %p2173_p5, %p2167_p10 }
  0x7e   : > { %2177 = shalt.err (!%p2174_p7)
}
  0x7f   : > { %1926 = dma.hbm_to_vmem [thread:$0]  (!%p2490_p0), %s2488_s23, 128, %s2494_s27, %s2496_s25, %s2260_s26, %s2260_s26, %s2261_s28  }
  0x80   : > { %p2781_p12 = scmp.ne.s32.totalorder %s2775_s22, 0 }
  0x81   : > { %s2530_s30 = sand.u32 (!%p2781_p12), 1, %s2246_s16   ;;  %p2782_p3 = scmp.ne.s32.totalorder (!%p2781_p12), %s2772_s20, 0 }
  0x82   : > { %297 = sbr.rel (%p2781_p12) target bundleno = 969 (0x3c9), region = 48  ;;  %s1546_s14 = sshll.u32 (!%p2781_p12), %s2530_s30, 3 }
  0x83   : > { %s300_s24 = scalar_lea.sflag (!%p2781_p12), [#allocation5], %s2530_s30  ;;  %s2534_s11 = scalar_lea.vmem (!%p2781_p12), [#allocation4], %s1546_s14 }
  0x89   : > { %2225 = dma.done.wait (%p2782_p3), %s300_s24, 128  }
  0x8a   : > { %2227 = vsyncadd (%p2782_p3), %s300_s24, 4294967168  ;;  %p2783_p0 = scmp.eq.s32.totalorder %s2346_s0, 0 }
  0x8c   : > { %2229 = dma.done.wait (%p2783_p0), [#allocation8], 6144   ;;  %p2784_p11 = pmov %p2783_p0 }
  0x8d   : > { %p2785_p2 = pmov %p2783_p0 }
  0x8e   : > { %2231 = vsyncadd (%p2784_p11), [#allocation8], 4294961152 }
  0x8f   : > { %2233 = dma.done.wait (%p2785_p2), [#allocation11], 3072   ;;  %p2786_p9 = pmov %p2783_p0 }
  0x90   : > { %v2263_v0 = vmov 0.0   ;;  %vm2264_vm0 = vmmov 0   ;;  %v1981_v1 = vld [vmem:[#allocation7] sm:$0xff]   ;;  %v1983_v3 = vld [vmem:[#allocation7 + $0x8] sm:$0xff]   ;;  %v1985_v5 = vld [vmem:[#allocation7 + $0x10] sm:$0xff]   ;;  %v350_v42 = vlaneseq  ;;  %s347_s20 = sld [smem:[#allocation3 + %s2346_s0]] }
  0x91   : > { %2235 = vsyncadd (%p2786_p9), [#allocation11], 4294964224  ;;  %1717 = vmatprep.subr.bf16.mxu0 %v2263_v0  ;;  %1737 = vmatprep.subr.bf16.mxu1 %v2263_v0  ;;  %v1982_v2 = vld [vmem:[#allocation7 + $0x40] sm:$0xff]   ;;  %v1984_v4 = vld [vmem:[#allocation7 + $0x48] sm:$0xff]   ;;  %s1550_s27 = sshll.u32 %s2530_s30, 4  ;;  %s1635_s12 = sshll.u32 %s2346_s0, 8 }
  0x92   : > { %1733 = vmatprep.mubr.msk.bf16.mxu0 %vm2264_vm0, %v2263_v0  ;;  %1753 = vmatprep.mubr.msk.bf16.mxu1 %vm2264_vm0, %v2263_v0  ;;  %v1986_v6 = vld [vmem:[#allocation7 + $0x50] sm:$0xff]   ;;  %v1987_v7 = vld [vmem:[#allocation7 + $0x18] sm:$0xff]   ;;  %v1989_v9 = vld [vmem:[#allocation7 + $0x20] sm:$0xff]   ;;  %v2601_v43 = vshrl.u32 %v350_v42, 7  ;;  %s345_s29 = scalar_lea.vmem [#allocation12], %s1550_s27  ;;  %s1421_s0 = scalar_lea.sflag [#allocation6], %s2530_s30 }
  0x93   : > { %1718 = vmatpush3.bf16.msra.mxu0 %v1981_v1  ;;  %1738 = vmatpush3.bf16.msra.mxu1 %v1982_v2  ;;  %v1988_v8 = vld [vmem:[#allocation7 + $0x58] sm:$0xff]   ;;  %v1990_v10 = vld [vmem:[#allocation7 + $0x60] sm:$0xff]   ;;  %v1991_v11 = vld [vmem:[#allocation7 + $0x28] sm:$0xff]   ;;  %s1434_s19 = sshll.u32 %s345_s29, 4  ;;  %s2265_s22 = smov [#allocation12]   ;;  %s2714_s19 = int_to_ptr.vmem [resolvable:$true] %s1434_s19 }
  0x94   : > { %1719 = vmatprep.subr.bf16.mxu0 %v2263_v0  ;;  %1739 = vmatprep.subr.bf16.mxu1 %v2263_v0  ;;  %v1992_v12 = vld [vmem:[#allocation7 + $0x68] sm:$0xff]   ;;  %v1993_v13 = vld [vmem:[#allocation7 + $0x30] sm:$0xff]   ;;  %v1995_v15 = vld [vmem:[#allocation7 + $0x38] sm:$0xff]   ;;  %vm689_vm1 = vcmp.lt.s32.totalorder %v2601_v43, 1  ;;  %vm353_vm2 = vcmp.gt.s32.totalorder %v2601_v43, 0  ;;  %v2613_v59 = vadd.s32 8, %v2601_v43 }
  0x95   : > { %v1994_v14 = vld [vmem:[#allocation7 + $0x70] sm:$0xff]   ;;  %v1997_v16 = vld [vmem:[#allocation7 + $0x78] sm:$0xff]   ;;  %v1998_v18 = vld [vmem:[#allocation7 + $0x80] sm:$0xff]   ;;  %vm700_vm3 = vcmp.lt.s32.totalorder %v2601_v43, 7  ;;  %s2182_s26 = sshll.u32 %s2265_s22, 4  ;;  %s2183_s26 = int_to_ptr.vmem [resolvable:$false] %s2182_s26 }
  0x96   : > { %v1996_v17 = vld [vmem:[%s2534_s11] sm:$0xff]   ;;  %v1999_v19 = vld [vmem:[#allocation7 + $0x88] sm:$0xff]   ;;  %v2002_v22 = vld [vmem:[#allocation7 + $0xa0] sm:$0xff]   ;;  %v357_v62 = vstv %s347_s20  ;;  %vm356_vm4 = vcmp.lt.s32.totalorder %v2613_v59, 15  ;;  %s2712_s11 = scalar_lea.hbm %s2767_s8, %s1635_s12  ;;  %s2178_s20 = scalar_lea.vmem %s2714_s19, 256 }
  0x97   : > { %1720 = vmatpush3.bf16.msra.mxu0 %v1983_v3  ;;  %1740 = vmatpush3.bf16.msra.mxu1 %v1984_v4  ;;  %v2000_v20 = vld [vmem:[#allocation7 + $0x90] sm:$0xff]   ;;  %v2001_v21 = vld [vmem:[#allocation7 + $0x98] sm:$0xff]   ;;  %v2003_v23 = vld [vmem:[#allocation7 + $0xa8] sm:$0xff]   ;;  %vm358_vm5 = vcmp.lt.s32.totalorder %v2601_v43, %v357_v62  ;;  %vm359_vm6 = vcmp.lt.s32.totalorder %v2613_v59, %v357_v62  ;;  %p2179_p13 = scmp.ne.s32.totalorder %s2714_s19, %s2178_s20  ;;  %s2184_s28 = scalar_lea.vmem %s2183_s26, 512 }
  0x98   : > { %1721 = vmatprep.subr.bf16.mxu0 %v2263_v0  ;;  %1741 = vmatprep.subr.bf16.mxu1 %v2263_v0  ;;  %v2004_v24 = vld [vmem:[#allocation7 + $0xb0] sm:$0xff]   ;;  %v2005_v25 = vld [vmem:[#allocation7 + $0xb8] sm:$0xff]   ;;  %v2006_v26 = vld [vmem:[#allocation9] sm:$0xff]   ;;  %p2185_p1 = scmp.lt.s32.totalorder %s2714_s19, %s2183_s26  ;;  %p2186_p4 = scmp.lt.s32.totalorder %s2184_s28, %s2178_s20 }
  0x99   : > { %v2007_v27 = vld [vmem:[#allocation9 + $0x40] sm:$0xff]   ;;  %v2008_v28 = vld [vmem:[#allocation9 + $0x8] sm:$0xff]   ;;  %v2010_v30 = vld [vmem:[#allocation9 + $0x10] sm:$0xff]   ;;  %p2180_p6 = pnand %p2179_p13, %p2479_p8 }
  0x9a   : > { %v2009_v29 = vld [vmem:[#allocation9 + $0x48] sm:$0xff]   ;;  %v2011_v31 = vld [vmem:[#allocation9 + $0x50] sm:$0xff]   ;;  %v2012_v32 = vld [vmem:[#allocation9 + $0x18] sm:$0xff]   ;;  %p2187_p5 = por %p2186_p4, %p2185_p1 }
  0x9b   : > { %1722 = vmatpush3.bf16.msra.mxu0 %v1985_v5  ;;  %1742 = vmatpush3.bf16.msra.mxu1 %v1986_v6  ;;  %v2013_v33 = vld [vmem:[#allocation9 + $0x58] sm:$0xff]   ;;  %v2014_v34 = vld [vmem:[#allocation9 + $0x20] sm:$0xff]   ;;  %v2016_v36 = vld [vmem:[#allocation9 + $0x28] sm:$0xff]   ;;  %p2181_p10 = pneg %p2180_p6 }
  0x9c   : > { %1723 = vmatprep.subr.bf16.mxu0 %v2263_v0  ;;  %1743 = vmatprep.subr.bf16.mxu1 %v2263_v0  ;;  %v2015_v35 = vld [vmem:[#allocation9 + $0x60] sm:$0xff]   ;;  %v2017_v37 = vld [vmem:[#allocation9 + $0x68] sm:$0xff]   ;;  %v2018_v38 = vld [vmem:[#allocation9 + $0x30] sm:$0xff]  }
  0x9d   : > { %v2019_v39 = vld [vmem:[#allocation9 + $0x70] sm:$0xff]   ;;  %v2020_v40 = vld [vmem:[#allocation9 + $0x38] sm:$0xff]   ;;  %p2188_p7 = pnand %p2187_p5, %p2181_p10 }
  0x9e   : > { %v2021_v41 = vld [vmem:[#allocation9 + $0x78] sm:$0xff]   ;;  %v1578_v6 = vld [vmem:[%s2762_s3] ss:$0 sm:$0xff] }
  0x9f   : > { %1724 = vmatpush3.bf16.msra.mxu0 %v1987_v7  ;;  %1744 = vmatpush3.bf16.msra.mxu1 %v1988_v8  ;;  %v2045_v42 = vld [vmem:[#allocation10 + $0x78] sm:$0xff]  }
  0xa0   : > { %1725 = vmatprep.subr.bf16.mxu0 %v2263_v0  ;;  %1745 = vmatprep.subr.bf16.mxu1 %v2263_v0 }
  0xa3   : > { %1726 = vmatpush3.bf16.msra.mxu0 %v1989_v9  ;;  %1746 = vmatpush3.bf16.msra.mxu1 %v1990_v10  ;;  %v2629_v10 = vsel %vm358_vm5, 1.0, %v2263_v0 }
  0xa4   : > { %1727 = vmatprep.subr.bf16.mxu0 %v2263_v0  ;;  %1747 = vmatprep.subr.bf16.mxu1 %v2263_v0 }
  0xa7   : > { %1728 = vmatpush3.bf16.msra.mxu0 %v1991_v11  ;;  %1748 = vmatpush3.bf16.msra.mxu1 %v1992_v12  ;;  %v2632_v12 = vsel %vm359_vm6, 1.0, %v2263_v0 }
  0xa8   : > { %1729 = vmatprep.subr.bf16.mxu0 %v2263_v0  ;;  %1749 = vmatprep.subr.bf16.mxu1 %v2263_v0 }
  0xab   : > { %1730 = vmatpush3.bf16.msra.mxu0 %v1993_v13  ;;  %1750 = vmatpush3.bf16.msra.mxu1 %v1994_v14 }
  0xac   : > { %1731 = vmatprep.subr.bf16.mxu0 %v2263_v0  ;;  %1751 = vmatprep.subr.bf16.mxu1 %v2263_v0 }
  0xaf   : > { %1732 = vmatpush3.bf16.msra.mxu0 %v1995_v15  ;;  %1752 = vmatpush3.bf16.msra.mxu1 %v1997_v16 }
  0xb0   : > { %1757 = vmatprep.subr.bf16.mxu0 %v2263_v0  ;;  %1777 = vmatprep.subr.bf16.mxu1 %v2263_v0 }
  0xb2   : > { %1734 = vmatmul.mubr.bf16.vlgmr.msra.gmra.mrb[0].mxu0 %v1996_v17  ;;  %1754 = vmatmul.mubr.bf16.vlgmr.msra.gmra.mrb[0].mxu1 %v1996_v17 }
  0xb3   : > { %1758 = vmatpush3.bf16.msra.mxu0 %v1998_v18  ;;  %1773 = vmatprep.mubr.msk.bf16.mxu0 %vm2264_vm0, %v2263_v0  ;;  %v2022_v18 = vld [vmem:[#allocation9 + $0x80] sm:$0xff]  }
  0xb4   : > { %1759 = vmatprep.subr.bf16.mxu0 %v2263_v0  ;;  %1793 = vmatprep.mubr.msk.bf16.mxu1 %vm2264_vm0, %v2263_v0 }
  0xb5   : > { %1778 = vmatpush3.bf16.msra.mxu1 %v2006_v26  ;;  %v2029_v26 = vld [vmem:[#allocation9 + $0xb8] sm:$0xff]  }
  0xb6   : > { %1779 = vmatprep.subr.bf16.mxu1 %v2263_v0 }
  0xb7   : > { %1760 = vmatpush3.bf16.msra.mxu0 %v1999_v19 }
  0xb8   : > { %1761 = vmatprep.subr.bf16.mxu0 %v2263_v0 }
  0xb9   : > { %1780 = vmatpush3.bf16.msra.mxu1 %v2008_v28  ;;  %v2031_v28 = vld [vmem:[#allocation10 + $0x40] sm:$0xff]  }
  0xba   : > { %1781 = vmatprep.subr.bf16.mxu1 %v2263_v0 }
  0xbb   : > { %1762 = vmatpush3.bf16.msra.mxu0 %v2000_v20  ;;  %v2023_v20 = vld [vmem:[#allocation9 + $0x88] sm:$0xff]  }
  0xbc   : > { %1763 = vmatprep.subr.bf16.mxu0 %v2263_v0 }
  0xbd   : > { %1782 = vmatpush3.bf16.msra.mxu1 %v2010_v30  ;;  %v2033_v30 = vld [vmem:[#allocation10 + $0x48] sm:$0xff]  }
  0xbe   : > { %1783 = vmatprep.subr.bf16.mxu1 %v2263_v0 }
  0xbf   : > { %1764 = vmatpush3.bf16.msra.mxu0 %v2001_v21  ;;  %v2024_v21 = vld [vmem:[#allocation9 + $0x90] sm:$0xff]  }
  0xc0   : > { %1765 = vmatprep.subr.bf16.mxu0 %v2263_v0 }
  0xc1   : > { %1784 = vmatpush3.bf16.msra.mxu1 %v2012_v32  ;;  %v2035_v32 = vld [vmem:[#allocation10 + $0x50] sm:$0xff]  }
  0xc2   : > { %1785 = vmatprep.subr.bf16.mxu1 %v2263_v0 }
  0xc3   : > { %1766 = vmatpush3.bf16.msra.mxu0 %v2002_v22  ;;  %v2025_v22 = vld [vmem:[#allocation9 + $0x98] sm:$0xff]  }
  0xc4   : > { %1767 = vmatprep.subr.bf16.mxu0 %v2263_v0 }
  0xc5   : > { %1786 = vmatpush3.bf16.msra.mxu1 %v2014_v34  ;;  %v2037_v34 = vld [vmem:[#allocation10 + $0x58] sm:$0xff]  }
  0xc6   : > { %1787 = vmatprep.subr.bf16.mxu1 %v2263_v0 }
  0xc7   : > { %1768 = vmatpush3.bf16.msra.mxu0 %v2003_v23  ;;  %v2026_v23 = vld [vmem:[#allocation9 + $0xa0] sm:$0xff]  }
  0xc8   : > { %1769 = vmatprep.subr.bf16.mxu0 %v2263_v0 }
  0xc9   : > { %1788 = vmatpush3.bf16.msra.mxu1 %v2016_v36  ;;  %v2039_v36 = vld [vmem:[#allocation10 + $0x60] sm:$0xff]  }
  0xca   : > { %1789 = vmatprep.subr.bf16.mxu1 %v2263_v0 }
  0xcb   : > { %1770 = vmatpush3.bf16.msra.mxu0 %v2004_v24  ;;  %v2027_v24 = vld [vmem:[#allocation9 + $0xa8] sm:$0xff]  }
  0xcc   : > { %1771 = vmatprep.subr.bf16.mxu0 %v2263_v0 }
  0xcd   : > { %1790 = vmatpush3.bf16.msra.mxu1 %v2018_v38  ;;  %v2041_v38 = vld [vmem:[#allocation10 + $0x68] sm:$0xff]  }
  0xce   : > { %1791 = vmatprep.subr.bf16.mxu1 %v2263_v0 }
  0xcf   : > { %1772 = vmatpush3.bf16.msra.mxu0 %v2005_v25  ;;  %v2028_v25 = vld [vmem:[#allocation9 + $0xb0] sm:$0xff]  }
  0xd0   : > { %1797 = vmatprep.subr.bf16.mxu0 %v2263_v0 }
  0xd1   : > { %1792 = vmatpush3.bf16.msra.mxu1 %v2020_v40  ;;  %v2043_v40 = vld [vmem:[#allocation10 + $0x70] sm:$0xff]  }
  0xd2   : > { %1774 = vmatmul.mubr.bf16.vlgmr.msra.gmra.mrb[4].mxu0 %v1996_v17  ;;  %1817 = vmatprep.subr.bf16.mxu1 %v2263_v0 }
  0xd3   : > { %1813 = vmatprep.mubr.msk.bf16.mxu0 %vm2264_vm0, %v2263_v0  ;;  %1798 = vmatpush3.bf16.msra.mxu0 %v2007_v27  ;;  %v2030_v27 = vld [vmem:[#allocation10] sm:$0xff]  }
  0xd4   : > { %1799 = vmatprep.subr.bf16.mxu0 %v2263_v0 }
  0xd7   : > { %1800 = vmatpush3.bf16.msra.mxu0 %v2009_v29  ;;  %v2032_v29 = vld [vmem:[#allocation10 + $0x8] sm:$0xff]  }
  0xd8   : > { %1801 = vmatprep.subr.bf16.mxu0 %v2263_v0 }
  0xdb   : > { %1802 = vmatpush3.bf16.msra.mxu0 %v2011_v31  ;;  %v2034_v31 = vld [vmem:[#allocation10 + $0x10] sm:$0xff]  }
  0xdc   : > { %1803 = vmatprep.subr.bf16.mxu0 %v2263_v0 }
  0xdf   : > { %1804 = vmatpush3.bf16.msra.mxu0 %v2013_v33  ;;  %v2036_v33 = vld [vmem:[#allocation10 + $0x18] sm:$0xff]  }
  0xe0   : > { %1805 = vmatprep.subr.bf16.mxu0 %v2263_v0 }
  0xe3   : > { %1806 = vmatpush3.bf16.msra.mxu0 %v2015_v35  ;;  %v2038_v35 = vld [vmem:[#allocation10 + $0x20] sm:$0xff]  }
  0xe4   : > { %1807 = vmatprep.subr.bf16.mxu0 %v2263_v0 }
  0xe7   : > { %1808 = vmatpush3.bf16.msra.mxu0 %v2017_v37  ;;  %v2040_v37 = vld [vmem:[#allocation10 + $0x28] sm:$0xff]  }
  0xe8   : > { %1809 = vmatprep.subr.bf16.mxu0 %v2263_v0 }
  0xeb   : > { %1810 = vmatpush3.bf16.msra.mxu0 %v2019_v39  ;;  %v2042_v39 = vld [vmem:[#allocation10 + $0x30] sm:$0xff]  }
  0xec   : > { %1811 = vmatprep.subr.bf16.mxu0 %v2263_v0 }
  0xef   : > { %1812 = vmatpush3.bf16.msra.mxu0 %v2021_v41  ;;  %v2044_v41 = vld [vmem:[#allocation10 + $0x38] sm:$0xff]  }
  0xf0   : > { %1837 = vmatprep.subr.bf16.mxu0 %v2263_v0 }
 0x185   : > { %v468_v44 = vpop.f32.mrb[0].mxu0  ;;  %v574_v47 = vpop.f32.mrb[0].mxu1 }
 0x186   : > { %v687_v45 = vrot.slane %v468_v44, 7  ;;  %v1735_v46 = vpop.f32.mrb[1].mxu0  ;;  %v1755_v49 = vpop.f32.mrb[1].mxu1 }
 0x187   : > { %v471_v48 = vpop.f32.mrb[2].mxu0  ;;  %v577_v52 = vpop.f32.mrb[2].mxu1 }
 0x188   : > { %v688_v50 = vrot.slane %v471_v48, 7  ;;  %v1736_v51 = vpop.f32.mrb[3].mxu0  ;;  %v1756_v53 = vpop.f32.mrb[3].mxu1 }
 0x18a   : > { %v691_v54 = vsel %vm689_vm1, %v688_v50, %v687_v45  ;;  %v690_v55 = vsel %vm689_vm1, %v687_v45, %v688_v50 }
 0x18b   : > { %v696_v56 = vsel %vm353_vm2, %v691_v54, 0.0  ;;  %v710_v57 = vadd.f32 %v690_v55, %v577_v52 }
 0x18c   : > { %v709_v58 = vadd.f32 %v696_v56, %v574_v47 }
 0x1a5   : > { %v680_v60 = vpop.f32.mrb[4].mxu0 }
 0x1a6   : > { %v1775_v61 = vpop.f32.mrb[5].mxu0  ;;  %v698_v1 = vrot.slane %v680_v60, 1 }
 0x1a7   : > { %v683_v63 = vpop.f32.mrb[6].mxu0 }
 0x1a8   : > { %v699_v2 = vrot.slane %v683_v63, 1  ;;  %v1776_v3 = vpop.f32.mrb[7].mxu0 }
 0x1aa   : > { %v701_v4 = vsel %vm700_vm3, %v698_v1, %v699_v2  ;;  %v702_v5 = vsel %vm700_vm3, %v699_v2, %v698_v1 }
 0x1ab   : > { %v708_v7 = vsel %vm356_vm4, %v702_v5, 0.0  ;;  %v711_v8 = vadd.f32 %v709_v58, %v701_v4  ;;  %v1603_v5 = vld [vmem:[%s2764_s5] ss:$0 sm:$0xff] }
 0x1ac   : > { %v712_v9 = vadd.f32 %v710_v57, %v708_v7 }
 0x1ad   : > { %v720_v11 = vadd.f32 %v1578_v6, %v711_v8 }
 0x1ae   : > { %v721_v13 = vadd.f32 %v1578_v6, %v712_v9 }
 0x1af   : > { %v722_v14 = vmul.f32 %v2629_v10, %v720_v11 }
 0x1b0   : > { %v723_v15 = vmul.f32 %v2632_v12, %v721_v13 }
 0x1b1   : > { %v724_v16 = vmax.f32 %v722_v14, 0.0 }
 0x1b2   : > { %v725_v17 = vmax.f32 %v723_v15, 0.0 }
 0x1b4   : > { %v726_v19 = vpack.c.bf16 %v725_v17, %v724_v16  ;;  %v2046_v17 = vld [vmem:[#allocation10 + $0x80] sm:$0xff]  }
 0x1b6   : > { %1794 = vmatmul.mubr.bf16.vlgmr.msra.gmra.mrb[4].mxu1 %v726_v19  ;;  %1814 = vmatmul.mubr.bf16.vlgmr.msra.gmra.mrb[8].mxu0 %v726_v19 }
 0x1b7   : > { %1818 = vmatpush3.bf16.msra.mxu1 %v2022_v18  ;;  %1833 = vmatprep.mubr.msk.bf16.mxu1 %vm2264_vm0, %v2263_v0 }
 0x1b8   : > { %1819 = vmatprep.subr.bf16.mxu1 %v2263_v0  ;;  %1853 = vmatprep.mubr.msk.bf16.mxu0 %vm2264_vm0, %v2263_v0 }
 0x1b9   : > { %1838 = vmatpush3.bf16.msra.mxu0 %v2030_v27 }
 0x1ba   : > { %1839 = vmatprep.subr.bf16.mxu0 %v2263_v0 }
 0x1bb   : > { %1820 = vmatpush3.bf16.msra.mxu1 %v2023_v20  ;;  %v2048_v20 = vld [vmem:[#allocation10 + $0x90] sm:$0xff]  }
 0x1bc   : > { %1821 = vmatprep.subr.bf16.mxu1 %v2263_v0 }
 0x1bd   : > { %1840 = vmatpush3.bf16.msra.mxu0 %v2032_v29 }
 0x1be   : > { %1841 = vmatprep.subr.bf16.mxu0 %v2263_v0 }
 0x1bf   : > { %1822 = vmatpush3.bf16.msra.mxu1 %v2024_v21  ;;  %v2049_v21 = vld [vmem:[#allocation10 + $0x98] sm:$0xff]  }
 0x1c0   : > { %1823 = vmatprep.subr.bf16.mxu1 %v2263_v0 }
 0x1c1   : > { %1842 = vmatpush3.bf16.msra.mxu0 %v2034_v31 }
 0x1c2   : > { %1843 = vmatprep.subr.bf16.mxu0 %v2263_v0 }
 0x1c3   : > { %1824 = vmatpush3.bf16.msra.mxu1 %v2025_v22  ;;  %v2050_v22 = vld [vmem:[#allocation10 + $0xa0] sm:$0xff]  }
 0x1c4   : > { %1825 = vmatprep.subr.bf16.mxu1 %v2263_v0 }
 0x1c5   : > { %1844 = vmatpush3.bf16.msra.mxu0 %v2036_v33 }
 0x1c6   : > { %1845 = vmatprep.subr.bf16.mxu0 %v2263_v0 }
 0x1c7   : > { %1826 = vmatpush3.bf16.msra.mxu1 %v2026_v23  ;;  %v2051_v23 = vld [vmem:[#allocation10 + $0xa8] sm:$0xff]  }
 0x1c8   : > { %1827 = vmatprep.subr.bf16.mxu1 %v2263_v0 }
 0x1c9   : > { %1846 = vmatpush3.bf16.msra.mxu0 %v2038_v35 }
 0x1ca   : > { %1847 = vmatprep.subr.bf16.mxu0 %v2263_v0 }
 0x1cb   : > { %1828 = vmatpush3.bf16.msra.mxu1 %v2027_v24  ;;  %v2052_v24 = vld [vmem:[#allocation10 + $0xb0] sm:$0xff]  }
 0x1cc   : > { %1829 = vmatprep.subr.bf16.mxu1 %v2263_v0 }
 0x1cd   : > { %1848 = vmatpush3.bf16.msra.mxu0 %v2040_v37 }
 0x1ce   : > { %1849 = vmatprep.subr.bf16.mxu0 %v2263_v0 }
 0x1cf   : > { %1830 = vmatpush3.bf16.msra.mxu1 %v2028_v25  ;;  %v2053_v25 = vld [vmem:[#allocation10 + $0xb8] sm:$0xff]  }
 0x1d0   : > { %1831 = vmatprep.subr.bf16.mxu1 %v2263_v0 }
 0x1d1   : > { %1850 = vmatpush3.bf16.msra.mxu0 %v2042_v39 }
 0x1d2   : > { %1851 = vmatprep.subr.bf16.mxu0 %v2263_v0 }
 0x1d3   : > { %1832 = vmatpush3.bf16.msra.mxu1 %v2029_v26 }
 0x1d4   : > { %1857 = vmatprep.subr.bf16.mxu1 %v2263_v0 }
 0x1d5   : > { %1852 = vmatpush3.bf16.msra.mxu0 %v2044_v41 }
 0x1d6   : > { %1834 = vmatmul.mubr.bf16.vlgmr.msra.gmra.mrb[8].mxu1 %v726_v19  ;;  %1877 = vmatprep.subr.bf16.mxu0 %v2263_v0  ;;  %v2047_v19 = vld [vmem:[#allocation10 + $0x88] sm:$0xff]  }
 0x1d7   : > { %1873 = vmatprep.mubr.msk.bf16.mxu1 %vm2264_vm0, %v2263_v0  ;;  %1858 = vmatpush3.bf16.msra.mxu1 %v2031_v28 }
 0x1d8   : > { %1859 = vmatprep.subr.bf16.mxu1 %v2263_v0 }
 0x1db   : > { %1860 = vmatpush3.bf16.msra.mxu1 %v2033_v30 }
 0x1dc   : > { %1861 = vmatprep.subr.bf16.mxu1 %v2263_v0 }
 0x1df   : > { %1862 = vmatpush3.bf16.msra.mxu1 %v2035_v32 }
 0x1e0   : > { %1863 = vmatprep.subr.bf16.mxu1 %v2263_v0 }
 0x1e3   : > { %1864 = vmatpush3.bf16.msra.mxu1 %v2037_v34 }
 0x1e4   : > { %1865 = vmatprep.subr.bf16.mxu1 %v2263_v0 }
 0x1e7   : > { %1866 = vmatpush3.bf16.msra.mxu1 %v2039_v36 }
 0x1e8   : > { %1867 = vmatprep.subr.bf16.mxu1 %v2263_v0 }
 0x1eb   : > { %1868 = vmatpush3.bf16.msra.mxu1 %v2041_v38 }
 0x1ec   : > { %1869 = vmatprep.subr.bf16.mxu1 %v2263_v0 }
 0x1ef   : > { %1870 = vmatpush3.bf16.msra.mxu1 %v2043_v40 }
 0x1f0   : > { %1871 = vmatprep.subr.bf16.mxu1 %v2263_v0 }
 0x1f3   : > { %1872 = vmatpush3.bf16.msra.mxu1 %v2045_v42 }
 0x289   : > { %v825_v44 = vpop.f32.mrb[4].mxu1  ;;  %v931_v45 = vpop.f32.mrb[8].mxu0 }
 0x28a   : > { %v1795_v46 = vpop.f32.mrb[5].mxu1  ;;  %v1815_v47 = vpop.f32.mrb[9].mxu0  ;;  %v1044_v50 = vrot.slane %v825_v44, 7 }
 0x28b   : > { %v828_v48 = vpop.f32.mrb[6].mxu1  ;;  %v934_v49 = vpop.f32.mrb[10].mxu0 }
 0x28c   : > { %v1045_v51 = vrot.slane %v828_v48, 7  ;;  %v1796_v52 = vpop.f32.mrb[7].mxu1  ;;  %v1816_v53 = vpop.f32.mrb[11].mxu0 }
 0x28e   : > { %v1047_v54 = vsel %vm689_vm1, %v1045_v51, %v1044_v50  ;;  %v1046_v55 = vsel %vm689_vm1, %v1044_v50, %v1045_v51 }
 0x28f   : > { %v1048_v56 = vsel %vm353_vm2, %v1047_v54, 0.0  ;;  %v1057_v57 = vadd.f32 %v1046_v55, %v934_v49  ;;  %v1628_v49 = vld [vmem:[%s2766_s7] ss:$0 sm:$0xff] }
 0x290   : > { %v1056_v58 = vadd.f32 %v1048_v56, %v931_v45 }
 0x2a9   : > { %v1037_v60 = vpop.f32.mrb[8].mxu1 }
 0x2aa   : > { %v1835_v61 = vpop.f32.mrb[9].mxu1  ;;  %v1050_v63 = vrot.slane %v1037_v60, 1 }
 0x2ab   : > { %v1040_v62 = vpop.f32.mrb[10].mxu1 }
 0x2ac   : > { %v1051_v1 = vrot.slane %v1040_v62, 1  ;;  %v1836_v2 = vpop.f32.mrb[11].mxu1 }
 0x2ae   : > { %v1052_v3 = vsel %vm700_vm3, %v1050_v63, %v1051_v1  ;;  %v1053_v4 = vsel %vm700_vm3, %v1051_v1, %v1050_v63 }
 0x2af   : > { %v1055_v6 = vsel %vm356_vm4, %v1053_v4, 0.0  ;;  %v1058_v7 = vadd.f32 %v1056_v58, %v1052_v3 }
 0x2b0   : > { %v1059_v8 = vadd.f32 %v1057_v57, %v1055_v6 }
 0x2b1   : > { %v1067_v9 = vadd.f32 %v1603_v5, %v1058_v7 }
 0x2b2   : > { %v1068_v11 = vadd.f32 %v1603_v5, %v1059_v8 }
 0x2b3   : > { %v1069_v13 = vmul.f32 %v2629_v10, %v1067_v9 }
 0x2b4   : > { %v1070_v14 = vmul.f32 %v2632_v12, %v1068_v11 }
 0x2b5   : > { %v1071_v15 = vmax.f32 %v1069_v13, 0.0 }
 0x2b6   : > { %v1072_v16 = vmax.f32 %v1070_v14, 0.0 }
 0x2b8   : > { %v1073_v18 = vpack.c.bf16 %v1072_v16, %v1071_v15 }
 0x2ba   : > { %1854 = vmatmul.mubr.bf16.vlgmr.msra.gmra.mrb[12].mxu0 %v1073_v18  ;;  %1874 = vmatmul.mubr.bf16.vlgmr.msra.gmra.mrb[12].mxu1 %v1073_v18 }
 0x2bb   : > { %1878 = vmatpush3.bf16.msra.mxu0 %v2046_v17  ;;  %1893 = vmatprep.mubr.msk.bf16.mxu0 %vm2264_vm0, %v2263_v0 }
 0x2bc   : > { %1879 = vmatprep.subr.bf16.mxu0 %v2263_v0 }
 0x2bf   : > { %1880 = vmatpush3.bf16.msra.mxu0 %v2047_v19 }
 0x2c0   : > { %1881 = vmatprep.subr.bf16.mxu0 %v2263_v0 }
 0x2c3   : > { %1882 = vmatpush3.bf16.msra.mxu0 %v2048_v20 }
 0x2c4   : > { %1883 = vmatprep.subr.bf16.mxu0 %v2263_v0 }
 0x2c7   : > { %1884 = vmatpush3.bf16.msra.mxu0 %v2049_v21 }
 0x2c8   : > { %1885 = vmatprep.subr.bf16.mxu0 %v2263_v0 }
 0x2cb   : > { %1886 = vmatpush3.bf16.msra.mxu0 %v2050_v22 }
 0x2cc   : > { %1887 = vmatprep.subr.bf16.mxu0 %v2263_v0 }
 0x2cf   : > { %1888 = vmatpush3.bf16.msra.mxu0 %v2051_v23 }
 0x2d0   : > { %1889 = vmatprep.subr.bf16.mxu0 %v2263_v0 }
 0x2d3   : > { %1890 = vmatpush3.bf16.msra.mxu0 %v2052_v24 }
 0x2d4   : > { %1891 = vmatprep.subr.bf16.mxu0 %v2263_v0 }
 0x2d7   : > { %1892 = vmatpush3.bf16.msra.mxu0 %v2053_v25 }
 0x2da   : > { %1894 = vmatmul.mubr.bf16.vlgmr.msra.gmra.mrb[16].mxu0 %v1073_v18 }
 0x38d   : > { %v1172_v26 = vpop.f32.mrb[12].mxu0  ;;  %v1278_v27 = vpop.f32.mrb[12].mxu1 }
 0x38e   : > { %v1855_v28 = vpop.f32.mrb[13].mxu0  ;;  %v1875_v29 = vpop.f32.mrb[13].mxu1  ;;  %v1391_v32 = vrot.slane %v1172_v26, 7 }
 0x38f   : > { %v1175_v30 = vpop.f32.mrb[14].mxu0  ;;  %v1281_v31 = vpop.f32.mrb[14].mxu1 }
 0x390   : > { %v1392_v33 = vrot.slane %v1175_v30, 7  ;;  %v1856_v34 = vpop.f32.mrb[15].mxu0  ;;  %v1876_v35 = vpop.f32.mrb[15].mxu1 }
 0x392   : > { %v1394_v36 = vsel %vm689_vm1, %v1392_v33, %v1391_v32  ;;  %v1393_v37 = vsel %vm689_vm1, %v1391_v32, %v1392_v33 }
 0x393   : > { %v1395_v0 = vsel %vm353_vm2, %v1394_v36, 0.0  ;;  %v1404_v38 = vadd.f32 %v1393_v37, %v1281_v31 }
 0x394   : > { %v1403_v39 = vadd.f32 %v1395_v0, %v1278_v27 }
 0x3ad   : > { %v1384_v40 = vpop.f32.mrb[16].mxu0 }
 0x3ae   : > { %v1895_v41 = vpop.f32.mrb[17].mxu0  ;;  %v1397_v44 = vrot.slane %v1384_v40, 1 }
 0x3af   : > { %v1387_v42 = vpop.f32.mrb[18].mxu0 }
 0x3b0   : > { %v1398_v45 = vrot.slane %v1387_v42, 1  ;;  %v1896_v46 = vpop.f32.mrb[19].mxu0 }
 0x3b2   : > { %v1399_v47 = vsel %vm700_vm3, %v1397_v44, %v1398_v45  ;;  %v1400_v48 = vsel %vm700_vm3, %v1398_v45, %v1397_v44 }
 0x3b3   : > { %v1402_v50 = vsel %vm356_vm4, %v1400_v48, 0.0  ;;  %v1405_v51 = vadd.f32 %v1403_v39, %v1399_v47 }
 0x3b4   : > { %v1406_v52 = vadd.f32 %v1404_v38, %v1402_v50 }
 0x3b5   : > { %v1414_v53 = vadd.f32 %v1628_v49, %v1405_v51 }
 0x3b6   : > { %v1415_v54 = vadd.f32 %v1628_v49, %v1406_v52 }
 0x3b7   : > { %v1416_v55 = vmul.f32 %v2629_v10, %v1414_v53 }
 0x3b8   : > { %v1417_v43 = vmul.f32 %v2632_v12, %v1415_v54 }
 0x3b9   : > { %1418 = vst [vmem:[%s345_s29] sm:$0xff] %v1416_v55 }
 0x3ba   : > { %1419 = vst [vmem:[%s345_s29 + $0x8] sm:$0xff] %v1417_v43 }
 0x3bb   : > { %2191 = shalt.err (!%p2188_p7)
}
 0x3bc   : > { %s2192_s23 = scalar_lea.hbm %s2712_s11, 256  ;;  %s2196_s25 = scalar_lea.hbm %s2767_s8, 512 }
 0x3bd   : > { %p2193_p12 = scmp.ne.s32.totalorder %s2712_s11, %s2192_s23  ;;  %p2197_p11 = scmp.lt.u32.totalorder %s2712_s11, %s2767_s8 }
 0x3be   : > { %p2198_p2 = scmp.lt.u32.totalorder %s2196_s25, %s2192_s23  ;;  %p2200_p13 = scmp.lt.u32.totalorder %s2192_s23, %s2712_s11 }
 0x3bf   : > { %p2194_p3 = pnand %p2193_p12, %p2479_p8 }
 0x3c0   : > { %p2199_p9 = por %p2198_p2, %p2197_p11 }
 0x3c1   : > { %p2195_p0 = pneg %p2194_p3 }
 0x3c2   : > { %p2201_p6 = por %p2200_p13, %p2199_p9 }
 0x3c4   : > { %p2202_p10 = pnand %p2201_p6, %p2195_p0 }
 0x3c6   : > { %2205 = shalt.err (!%p2202_p10)
}
 0x3c7   : > { %s2266_s14 = smov 128   ;;  %s2267_s24 = smov 8  }
 0x3c8   : > { %1911 = dma.vmem_to_hbm [thread:$0]  (%p2479_p8), %s2714_s19, 256, %s2712_s11, %s1421_s0, %s2266_s14, %s2266_s14, %s2267_s24  }
 0x3c9 PF: > { %s2787_s20 = sld [smem:[#allocation18_spill]]  ;;  %s1449_s22 = sand.u32 1, %s2242_s15  }
 0x3ca   : > { %p2789_p4 = scmp.ge.s32.totalorder %s2254_s18, 2  ;;  %s1450_s26 = scalar_lea.sflag [#allocation6], %s1449_s22 }
 0x3cf   : > { %p2788_p1 = scmp.ne.s32.totalorder %s2787_s20, 0 }
 0x3d1   : > { %p1928_p5 = pnand %p2789_p4, %p2788_p1 }
 0x3d3   : > { %2237 = dma.done.wait (!%p1928_p5), %s1450_s26, 256  }
 0x3d4   : > { %2239 = vsyncadd (!%p1928_p5), %s1450_s26, 4294967040  ;;  %p27_p7 = scmp.ge.s32.totalorder %s2465_s13, 4   ;;  %s2790_s15 = smov %s2246_s16 }
 0x3d5   : > { %s2791_s16 = smov %s2250_s17  ;;  %s2792_s17 = smov %s2475_s9 }
 0x3d6   : > { %s2793_s18 = smov %s2465_s13  ;;  %29 = sbr.rel (!%p27_p7) target bundleno = 19 (0x13), region = 111 }
 0x3dd   :  { %1455 = vsyncpa [#allocation5], 1 }
 0x3de   :  { %1457 = vsyncpa [#allocation5 + $0x1], 1 }
 0x3df   :  { %1458 = vsyncpa [#allocation8], 1 }
 0x3e0   :  { %1459 = vsyncpa [#allocation11], 1 }
 0x3e1   :  { %1460 = vsyncpa [#allocation6], 1 }
 0x3e2   :  { %1462 = vsyncpa [#allocation6 + $0x1], 1 }

// kernel: tpu_custom_call.1
= control target key start
LH: loop header
LB: loop body
LE: loop exit
PB: predicated region body
PF: predicated region fallthrough
CT: control target
= control target key end

     0   :  { %s2759_s0 = inlined_call_operand.hbm [shape: s32[2], index: 0, kind: input, shape index: {}]   ;;  %s2760_s1 = inlined_call_operand.hbm [shape: bf16[2,16,128], index: 1, kind: input, shape index: {}]   ;;  %s2761_s2 = inlined_call_operand.hbm [shape: bf16[3,128,128], index: 2, kind: input, shape index: {}]   ;;  %s2762_s3 = inlined_call_operand.vmem [shape: f32[1,128], index: 3, kind: input, shape index: {}]   ;;  %s2763_s4 = inlined_call_operand.hbm [shape: bf16[3,128,128], index: 4, kind: input, shape index: {}]   ;;  %s2764_s5 = inlined_call_operand.vmem [shape: f32[1,128], index: 5, kind: input, shape index: {}]   ;;  %s2765_s6 = inlined_call_operand.hbm [shape: bf16[3,128,128], index: 6, kind: input, shape index: {}]   ;;  %s2766_s7 = inlined_call_operand.vmem [shape: f32[1,128], index: 7, kind: input, shape index: {}]   ;;  %s2767_s8 = inlined_call_operand.hbm [shape: f32[2,16,128], index: 8, kind: output, shape index: {}]  }
   0x1   :  { %s2054_s29 = scalar_lea.hbm %s2759_s0, 16 }
   0x2   :  { %p2055_p0 = scmp.ne.s32.totalorder %s2759_s0, %s2054_s29  ;;  %p2058_p1 = scmp.lt.u32.totalorder %s2054_s29, %s2759_s0 }
   0x4   :  { %p2060_p2 = pnand %p2058_p1, %p2055_p0 }
   0x6   :  { %2063 = shalt.err (!%p2060_p2)  }
   0x7   :  { %s2256_s12 = smov [#allocation3]  }
   0x8   :  { %14 = dma.hbm_to_smem %s2759_s0, 16, %s2256_s12, [#allocation2] }
   0x9   :  { %2222 = dma.done.wait [#allocation2], 16 }
   0xa   :  { %2223 = vsyncadd [#allocation2], 4294967280 }
   0xb   :  { %16 = sfence }
   0xc   :  { %17 = vsyncpa [#allocation5], 0 }
   0xd   :  { %19 = vsyncpa [#allocation5 + $0x1], 0 }
   0xe   :  { %20 = vsyncpa [#allocation8], 0 }
   0xf   :  { %21 = vsyncpa [#allocation11], 0 }
  0x10   :  { %22 = vsyncpa [#allocation6], 0 }
  0x11   :  { %24 = vsyncpa [#allocation6 + $0x1], 0  ;;  %s2325_s15 = smov 0   ;;  %s2327_s16 = smov 0  }
  0x12   :  { %s2329_s17 = smov 0   ;;  %s2331_s18 = smov 0  }
  0x13 LB: > { %s2346_s0 = sadd.s32 4294967295, %s2254_s18   ;;  %s1536_s19 = sadd.s32 4294967294, %s2254_s18   ;;  %s2254_s18 = sphi %s2331_s18, %s2793_s18   ;;  %s2250_s17 = sphi %s2329_s17, %s2792_s17   ;;  %s2246_s16 = sphi %s2327_s16, %s2791_s16   ;;  %s2242_s15 = sphi %s2325_s15, %s2790_s15  }
  0x14   : > { %p50_p3 = scmp.ne.s32.totalorder %s2246_s16, %s2242_s15  ;;  %p2768_p4 = scmp.eq.s32.totalorder %s2346_s0, 0 }
  0x15   : > { %p206_p6 = scmp.eq.s32.totalorder %s1536_s19, 1  ;;  %p1537_p8 = scmp.ge.s32.totalorder %s2254_s18, 1 }
  0x16   : > { %p2355_p7 = por %p2768_p4, %p50_p3  ;;  %p213_p10 = scmp.lt.s32.totalorder %s2254_s18, 3 }
  0x17   : > { %p2360_p9 = por %p206_p6, %p50_p3  ;;  %s2257_s23 = smov [#allocation7]  }
  0x18   : > { %s2772_s20 = scalar_select %p2355_p7, 1, 0 }
  0x19   : > { %s2773_s21 = scalar_select %p2360_p9, 1, 0 }
  0x1a   : > { %p2365_p11 = pnand %p1537_p8, %p213_p10  ;;  %s225_s24 = sshll.u32 %s2257_s23, 4  ;;  %s2369_s24 = int_to_ptr.vmem [resolvable:$true] %s225_s24 }
  0x1b   : > { %2774 = sst [smem:[#allocation18_spill]] %s2773_s21  ;;  %s2258_s26 = smov [#allocation9]  }
  0x1c   : > { %s2775_s22 = scalar_select %p2365_p11, 1, 0 }
  0x1d   : > { %p1913_p12 = pneg %p2365_p11  ;;  %s241_s27 = sshll.u32 %s2258_s26, 4  ;;  %s2380_s27 = int_to_ptr.vmem [resolvable:$true] %s241_s27 }
  0x1e   : > { %s2259_s28 = smov [#allocation10]   ;;  %s2064_s10 = scalar_lea.hbm %s2761_s2, 3072 }
  0x1f   : > { %p2376_p0 = pnand %p1913_p12, %p2768_p4  ;;  %s2382_s29 = sshll.u32 %s2259_s28, 4  ;;  %s258_s29 = int_to_ptr.vmem [resolvable:$true] %s2382_s29 }
  0x20   : > { %p2065_p1 = scmp.ne.s32.totalorder %s2761_s2, %s2064_s10  ;;  %p2071_p8 = scmp.lt.u32.totalorder %s2064_s10, %s2761_s2 }
  0x21   : > { %p2392_p2 = pneg %p2376_p0 }
  0x23   : > { %p2067_p3 = pnand %p2392_p2, %p2065_p1 }
  0x25   : > { %p2068_p6 = pneg %p2067_p3 }
  0x27   : > { %p2073_p10 = pnand %p2071_p8, %p2068_p6 }
  0x29   : > { %2076 = shalt.err (!%p2073_p10)
}
  0x2a   : > { %s2077_s23 = scalar_lea.vmem %s2369_s24, 3072  ;;  %p2085_p5 = scmp.lt.s32.totalorder %s2369_s24, %s2369_s24 }
  0x2b   : > { %p2078_p12 = scmp.ne.s32.totalorder %s2369_s24, %s2077_s23  ;;  %p2086_p9 = scmp.lt.s32.totalorder %s2077_s23, %s2077_s23 }
  0x2d   : > { %p2080_p13 = pnand %p2078_p12, %p2392_p2  ;;  %p2087_p1 = por %p2086_p9, %p2085_p5 }
  0x2f   : > { %p2081_p4 = pneg %p2080_p13 }
  0x31   : > { %p2088_p3 = pnand %p2087_p1, %p2081_p4 }
  0x33   : > { %2091 = shalt.err (!%p2088_p3)
}
  0x34   : > { %s2260_s26 = smov 64   ;;  %s2261_s28 = smov 4  }
  0x35   : > { %1916 = dma.hbm_to_vmem [thread:$0]  (!%p2376_p0), %s2761_s2, 3072, %s2369_s24, [#allocation8], %s2260_s26, %s2260_s26, %s2261_s28  }
  0x36   : > { %s2092_s12 = scalar_lea.hbm %s2763_s4, 3072 }
  0x37   : > { %p2093_p4 = scmp.ne.s32.totalorder %s2763_s4, %s2092_s12  ;;  %p2099_p13 = scmp.lt.u32.totalorder %s2092_s12, %s2763_s4 }
  0x39   : > { %p2095_p5 = pnand %p2093_p4, %p2392_p2 }
  0x3b   : > { %p2096_p9 = pneg %p2095_p5 }
  0x3d   : > { %p2101_p6 = pnand %p2099_p13, %p2096_p9 }
  0x3f   : > { %2104 = shalt.err (!%p2101_p6)
}
  0x40   : > { %s2105_s24 = scalar_lea.vmem %s2380_s27, 3072  ;;  %p2113_p1 = scmp.lt.s32.totalorder %s2380_s27, %s2380_s27 }
  0x41   : > { %p2106_p8 = scmp.ne.s32.totalorder %s2380_s27, %s2105_s24  ;;  %p2114_p3 = scmp.lt.s32.totalorder %s2105_s24, %s2105_s24 }
  0x43   : > { %p2108_p10 = pnand %p2106_p8, %p2392_p2  ;;  %p2115_p4 = por %p2114_p3, %p2113_p1 }
  0x45   : > { %p2109_p12 = pneg %p2108_p10 }
  0x47   : > { %p2116_p5 = pnand %p2115_p4, %p2109_p12 }
  0x49   : > { %2119 = shalt.err (!%p2116_p5)
}
  0x4a   : > { %1919 = dma.hbm_to_vmem [thread:$0]  (!%p2376_p0), %s2763_s4, 3072, %s2380_s27, [#allocation8], %s2260_s26, %s2260_s26, %s2261_s28  }
  0x4b   : > { %s2120_s11 = scalar_lea.hbm %s2765_s6, 3072 }
  0x4c   : > { %p2121_p9 = scmp.ne.s32.totalorder %s2765_s6, %s2120_s11  ;;  %p2127_p8 = scmp.lt.u32.totalorder %s2120_s11, %s2765_s6 }
  0x4e   : > { %p2123_p13 = pnand %p2121_p9, %p2392_p2 }
  0x50   : > { %p2124_p6 = pneg %p2123_p13 }
  0x52   : > { %p2129_p10 = pnand %p2127_p8, %p2124_p6 }
  0x54   : > { %2132 = shalt.err (!%p2129_p10)
}
  0x55   : > { %s2133_s24 = scalar_lea.vmem %s258_s29, 3072  ;;  %p2141_p4 = scmp.lt.s32.totalorder %s258_s29, %s258_s29 }
  0x56   : > { %p2134_p12 = scmp.ne.s32.totalorder %s258_s29, %s2133_s24  ;;  %p2142_p5 = scmp.lt.s32.totalorder %s2133_s24, %s2133_s24 }
  0x58   : > { %p2136_p1 = pnand %p2134_p12, %p2392_p2  ;;  %p2143_p7 = por %p2142_p5, %p2141_p4 }
  0x5a   : > { %p2137_p3 = pneg %p2136_p1 }
  0x5c   : > { %p2144_p11 = pnand %p2143_p7, %p2137_p3 }
  0x5e   : > { %2147 = shalt.err (!%p2144_p11)
}
  0x5f   : > { %1922 = dma.hbm_to_vmem [thread:$0]  (!%p2376_p0), %s2765_s6, 3072, %s258_s29, [#allocation11], %s2260_s26, %s2260_s26, %s2261_s28  }
  0x60   : > { %s2465_s13 = sadd.s32 1, %s2254_s18   ;;  %s37_s30 = sadd.s32 1, %s2250_s17 }
  0x61   : > { %s34_s25 = ssub.s32 %s2254_s18, %s2465_s13  ;;  %p44_p11 = scmp.ne.s32.totalorder %s2250_s17, %s2246_s16 }
  0x62   : > { %p35_p7 = scmp.eq.s32.totalorder %s34_s25, 0  ;;  %p45_p2 = scmp.eq.s32.totalorder %s2254_s18, 0 }
  0x63   : > { %p1934_p9 = scmp.lt.s32.totalorder %s2254_s18, 2  ;;  %p2778_p6 = scmp.eq.s32.totalorder %s2346_s0, 1 }
  0x64   : > { %s2475_s9 = scalar_select %p35_p7, %s2250_s17, %s37_s30  }
  0x65   : > { %p46_p13 = por %p45_p2, %p44_p11  ;;  %p2479_p8 = por %p2778_p6, %p44_p11 }
  0x66   : > { %s274_s11 = sand.u32 1, %s2250_s17   ;;  %s1634_s12 = sshll.u32 %s2254_s18, 7 }
  0x67   : > { %s1542_s29 = sshll.u32 %s274_s11, 3  ;;  %s2488_s23 = scalar_lea.hbm %s2760_s1, %s1634_s12 }
  0x68   : > { %s278_s24 = scalar_lea.vmem [#allocation4], %s1542_s29  ;;  %p2490_p0 = pnand %p1934_p9, %p46_p13 }
  0x69   : > { %s285_s27 = sshll.u32 %s278_s24, 4  ;;  %s2496_s25 = scalar_lea.sflag [#allocation5], %s274_s11  ;;  %s2494_s27 = int_to_ptr.vmem [resolvable:$true] %s285_s27 }
  0x6a   : > { %s2148_s30 = scalar_lea.hbm %s2488_s23, 128  ;;  %p2150_p12 = pneg %p2490_p0 }
  0x6b   : > { %p2149_p10 = scmp.ne.s32.totalorder %s2488_s23, %s2148_s30  ;;  %s2153_s14 = scalar_lea.hbm %s2760_s1, 256 }
  0x6c   : > { %p2154_p4 = scmp.lt.u32.totalorder %s2488_s23, %s2760_s1  ;;  %p2155_p5 = scmp.lt.u32.totalorder %s2153_s14, %s2148_s30 }
  0x6d   : > { %p2151_p1 = pnand %p2150_p12, %p2149_p10  ;;  %p2157_p11 = scmp.lt.u32.totalorder %s2148_s30, %s2488_s23 }
  0x6e   : > { %p2156_p7 = por %p2155_p5, %p2154_p4 }
  0x6f   : > { %p2152_p3 = pneg %p2151_p1 }
  0x70   : > { %p2158_p2 = por %p2157_p11, %p2156_p7 }
  0x72   : > { %p2159_p9 = pnand %p2158_p2, %p2152_p3 }
  0x74   : > { %2162 = shalt.err (!%p2159_p9)
}
  0x75   : > { %s2163_s11 = scalar_lea.vmem %s2494_s27, 128  ;;  %s2262_s12 = smov [#allocation4]  }
  0x76   : > { %p2164_p13 = scmp.ne.s32.totalorder %s2494_s27, %s2163_s11  ;;  %s2168_s29 = sshll.u32 %s2262_s12, 4  ;;  %s2169_s29 = int_to_ptr.vmem [resolvable:$false] %s2168_s29 }
  0x77   : > { %s2170_s19 = scalar_lea.vmem %s2169_s29, 256  ;;  %p2171_p1 = scmp.lt.s32.totalorder %s2494_s27, %s2169_s29 }
  0x78   : > { %p2166_p6 = pnand %p2164_p13, %p2150_p12  ;;  %p2172_p4 = scmp.lt.s32.totalorder %s2170_s19, %s2163_s11 }
  0x7a   : > { %p2167_p10 = pneg %p2166_p6  ;;  %p2173_p5 = por %p2172_p4, %p2171_p1 }
  0x7c   : > { %p2174_p7 = pnand %p2173_p5, %p2167_p10 }
  0x7e   : > { %2177 = shalt.err (!%p2174_p7)
}
  0x7f   : > { %1926 = dma.hbm_to_vmem [thread:$0]  (!%p2490_p0), %s2488_s23, 128, %s2494_s27, %s2496_s25, %s2260_s26, %s2260_s26, %s2261_s28  }
  0x80   : > { %p2781_p12 = scmp.ne.s32.totalorder %s2775_s22, 0 }
  0x81   : > { %s2530_s30 = sand.u32 (!%p2781_p12), 1, %s2246_s16   ;;  %p2782_p3 = scmp.ne.s32.totalorder (!%p2781_p12), %s2772_s20, 0 }
  0x82   : > { %297 = sbr.rel (%p2781_p12) target bundleno = 969 (0x3c9), region = 48  ;;  %s1546_s14 = sshll.u32 (!%p2781_p12), %s2530_s30, 3 }
  0x83   : > { %s300_s24 = scalar_lea.sflag (!%p2781_p12), [#allocation5], %s2530_s30  ;;  %s2534_s11 = scalar_lea.vmem (!%p2781_p12), [#allocation4], %s1546_s14 }
  0x89   : > { %2225 = dma.done.wait (%p2782_p3), %s300_s24, 128  }
  0x8a   : > { %2227 = vsyncadd (%p2782_p3), %s300_s24, 4294967168  ;;  %p2783_p0 = scmp.eq.s32.totalorder %s2346_s0, 0 }
  0x8c   : > { %2229 = dma.done.wait (%p2783_p0), [#allocation8], 6144   ;;  %p2784_p11 = pmov %p2783_p0 }
  0x8d   : > { %p2785_p2 = pmov %p2783_p0 }
  0x8e   : > { %2231 = vsyncadd (%p2784_p11), [#allocation8], 4294961152 }
  0x8f   : > { %2233 = dma.done.wait (%p2785_p2), [#allocation11], 3072   ;;  %p2786_p9 = pmov %p2783_p0 }
  0x90   : > { %v2263_v0 = vmov 0.0   ;;  %vm2264_vm0 = vmmov 0   ;;  %v1981_v1 = vld [vmem:[#allocation7] sm:$0xff]   ;;  %v1983_v3 = vld [vmem:[#allocation7 + $0x8] sm:$0xff]   ;;  %v1985_v5 = vld [vmem:[#allocation7 + $0x10] sm:$0xff]   ;;  %v350_v42 = vlaneseq  ;;  %s347_s20 = sld [smem:[#allocation3 + %s2346_s0]] }
  0x91   : > { %2235 = vsyncadd (%p2786_p9), [#allocation11], 4294964224  ;;  %1717 = vmatprep.subr.bf16.mxu0 %v2263_v0  ;;  %1737 = vmatprep.subr.bf16.mxu1 %v2263_v0  ;;  %v1982_v2 = vld [vmem:[#allocation7 + $0x40] sm:$0xff]   ;;  %v1984_v4 = vld [vmem:[#allocation7 + $0x48] sm:$0xff]   ;;  %s1550_s27 = sshll.u32 %s2530_s30, 4  ;;  %s1635_s12 = sshll.u32 %s2346_s0, 8 }
  0x92   : > { %1733 = vmatprep.mubr.msk.bf16.mxu0 %vm2264_vm0, %v2263_v0  ;;  %1753 = vmatprep.mubr.msk.bf16.mxu1 %vm2264_vm0, %v2263_v0  ;;  %v1986_v6 = vld [vmem:[#allocation7 + $0x50] sm:$0xff]   ;;  %v1987_v7 = vld [vmem:[#allocation7 + $0x18] sm:$0xff]   ;;  %v1989_v9 = vld [vmem:[#allocation7 + $0x20] sm:$0xff]   ;;  %v2601_v43 = vshrl.u32 %v350_v42, 7  ;;  %s345_s29 = scalar_lea.vmem [#allocation12], %s1550_s27  ;;  %s1421_s0 = scalar_lea.sflag [#allocation6], %s2530_s30 }
  0x93   : > { %1718 = vmatpush3.bf16.msra.mxu0 %v1981_v1  ;;  %1738 = vmatpush3.bf16.msra.mxu1 %v1982_v2  ;;  %v1988_v8 = vld [vmem:[#allocation7 + $0x58] sm:$0xff]   ;;  %v1990_v10 = vld [vmem:[#allocation7 + $0x60] sm:$0xff]   ;;  %v1991_v11 = vld [vmem:[#allocation7 + $0x28] sm:$0xff]   ;;  %s1434_s19 = sshll.u32 %s345_s29, 4  ;;  %s2265_s22 = smov [#allocation12]   ;;  %s2714_s19 = int_to_ptr.vmem [resolvable:$true] %s1434_s19 }
  0x94   : > { %1719 = vmatprep.subr.bf16.mxu0 %v2263_v0  ;;  %1739 = vmatprep.subr.bf16.mxu1 %v2263_v0  ;;  %v1992_v12 = vld [vmem:[#allocation7 + $0x68] sm:$0xff]   ;;  %v1993_v13 = vld [vmem:[#allocation7 + $0x30] sm:$0xff]   ;;  %v1995_v15 = vld [vmem:[#allocation7 + $0x38] sm:$0xff]   ;;  %vm689_vm1 = vcmp.lt.s32.totalorder %v2601_v43, 1  ;;  %vm353_vm2 = vcmp.gt.s32.totalorder %v2601_v43, 0  ;;  %v2613_v59 = vadd.s32 8, %v2601_v43 }
  0x95   : > { %v1994_v14 = vld [vmem:[#allocation7 + $0x70] sm:$0xff]   ;;  %v1997_v16 = vld [vmem:[#allocation7 + $0x78] sm:$0xff]   ;;  %v1998_v18 = vld [vmem:[#allocation7 + $0x80] sm:$0xff]   ;;  %vm700_vm3 = vcmp.lt.s32.totalorder %v2601_v43, 7  ;;  %s2182_s26 = sshll.u32 %s2265_s22, 4  ;;  %s2183_s26 = int_to_ptr.vmem [resolvable:$false] %s2182_s26 }
  0x96   : > { %v1996_v17 = vld [vmem:[%s2534_s11] sm:$0xff]   ;;  %v1999_v19 = vld [vmem:[#allocation7 + $0x88] sm:$0xff]   ;;  %v2002_v22 = vld [vmem:[#allocation7 + $0xa0] sm:$0xff]   ;;  %v357_v62 = vstv %s347_s20  ;;  %vm356_vm4 = vcmp.lt.s32.totalorder %v2613_v59, 15  ;;  %s2712_s11 = scalar_lea.hbm %s2767_s8, %s1635_s12  ;;  %s2178_s20 = scalar_lea.vmem %s2714_s19, 256 }
  0x97   : > { %1720 = vmatpush3.bf16.msra.mxu0 %v1983_v3  ;;  %1740 = vmatpush3.bf16.msra.mxu1 %v1984_v4  ;;  %v2000_v20 = vld [vmem:[#allocation7 + $0x90] sm:$0xff]   ;;  %v2001_v21 = vld [vmem:[#allocation7 + $0x98] sm:$0xff]   ;;  %v2003_v23 = vld [vmem:[#allocation7 + $0xa8] sm:$0xff]   ;;  %vm358_vm5 = vcmp.lt.s32.totalorder %v2601_v43, %v357_v62  ;;  %vm359_vm6 = vcmp.lt.s32.totalorder %v2613_v59, %v357_v62  ;;  %p2179_p13 = scmp.ne.s32.totalorder %s2714_s19, %s2178_s20  ;;  %s2184_s28 = scalar_lea.vmem %s2183_s26, 512 }
  0x98   : > { %1721 = vmatprep.subr.bf16.mxu0 %v2263_v0  ;;  %1741 = vmatprep.subr.bf16.mxu1 %v2263_v0  ;;  %v2004_v24 = vld [vmem:[#allocation7 + $0xb0] sm:$0xff]   ;;  %v2005_v25 = vld [vmem:[#allocation7 + $0xb8] sm:$0xff]   ;;  %v2006_v26 = vld [vmem:[#allocation9] sm:$0xff]   ;;  %p2185_p1 = scmp.lt.s32.totalorder %s2714_s19, %s2183_s26  ;;  %p2186_p4 = scmp.lt.s32.totalorder %s2184_s28, %s2178_s20 }
  0x99   : > { %v2007_v27 = vld [vmem:[#allocation9 + $0x40] sm:$0xff]   ;;  %v2008_v28 = vld [vmem:[#allocation9 + $0x8] sm:$0xff]   ;;  %v2010_v30 = vld [vmem:[#allocation9 + $0x10] sm:$0xff]   ;;  %p2180_p6 = pnand %p2179_p13, %p2479_p8 }
  0x9a   : > { %v2009_v29 = vld [vmem:[#allocation9 + $0x48] sm:$0xff]   ;;  %v2011_v31 = vld [vmem:[#allocation9 + $0x50] sm:$0xff]   ;;  %v2012_v32 = vld [vmem:[#allocation9 + $0x18] sm:$0xff]   ;;  %p2187_p5 = por %p2186_p4, %p2185_p1 }
  0x9b   : > { %1722 = vmatpush3.bf16.msra.mxu0 %v1985_v5  ;;  %1742 = vmatpush3.bf16.msra.mxu1 %v1986_v6  ;;  %v2013_v33 = vld [vmem:[#allocation9 + $0x58] sm:$0xff]   ;;  %v2014_v34 = vld [vmem:[#allocation9 + $0x20] sm:$0xff]   ;;  %v2016_v36 = vld [vmem:[#allocation9 + $0x28] sm:$0xff]   ;;  %p2181_p10 = pneg %p2180_p6 }
  0x9c   : > { %1723 = vmatprep.subr.bf16.mxu0 %v2263_v0  ;;  %1743 = vmatprep.subr.bf16.mxu1 %v2263_v0  ;;  %v2015_v35 = vld [vmem:[#allocation9 + $0x60] sm:$0xff]   ;;  %v2017_v37 = vld [vmem:[#allocation9 + $0x68] sm:$0xff]   ;;  %v2018_v38 = vld [vmem:[#allocation9 + $0x30] sm:$0xff]  }
  0x9d   : > { %v2019_v39 = vld [vmem:[#allocation9 + $0x70] sm:$0xff]   ;;  %v2020_v40 = vld [vmem:[#allocation9 + $0x38] sm:$0xff]   ;;  %p2188_p7 = pnand %p2187_p5, %p2181_p10 }
  0x9e   : > { %v2021_v41 = vld [vmem:[#allocation9 + $0x78] sm:$0xff]   ;;  %v1578_v6 = vld [vmem:[%s2762_s3] ss:$0 sm:$0xff] }
  0x9f   : > { %1724 = vmatpush3.bf16.msra.mxu0 %v1987_v7  ;;  %1744 = vmatpush3.bf16.msra.mxu1 %v1988_v8  ;;  %v2045_v42 = vld [vmem:[#allocation10 + $0x78] sm:$0xff]  }
  0xa0   : > { %1725 = vmatprep.subr.bf16.mxu0 %v2263_v0  ;;  %1745 = vmatprep.subr.bf16.mxu1 %v2263_v0 }
  0xa3   : > { %1726 = vmatpush3.bf16.msra.mxu0 %v1989_v9  ;;  %1746 = vmatpush3.bf16.msra.mxu1 %v1990_v10  ;;  %v2629_v10 = vsel %vm358_vm5, 1.0, %v2263_v0 }
  0xa4   : > { %1727 = vmatprep.subr.bf16.mxu0 %v2263_v0  ;;  %1747 = vmatprep.subr.bf16.mxu1 %v2263_v0 }
  0xa7   : > { %1728 = vmatpush3.bf16.msra.mxu0 %v1991_v11  ;;  %1748 = vmatpush3.bf16.msra.mxu1 %v1992_v12  ;;  %v2632_v12 = vsel %vm359_vm6, 1.0, %v2263_v0 }
  0xa8   : > { %1729 = vmatprep.subr.bf16.mxu0 %v2263_v0  ;;  %1749 = vmatprep.subr.bf16.mxu1 %v2263_v0 }
  0xab   : > { %1730 = vmatpush3.bf16.msra.mxu0 %v1993_v13  ;;  %1750 = vmatpush3.bf16.msra.mxu1 %v1994_v14 }
  0xac   : > { %1731 = vmatprep.subr.bf16.mxu0 %v2263_v0  ;;  %1751 = vmatprep.subr.bf16.mxu1 %v2263_v0 }
  0xaf   : > { %1732 = vmatpush3.bf16.msra.mxu0 %v1995_v15  ;;  %1752 = vmatpush3.bf16.msra.mxu1 %v1997_v16 }
  0xb0   : > { %1757 = vmatprep.subr.bf16.mxu0 %v2263_v0  ;;  %1777 = vmatprep.subr.bf16.mxu1 %v2263_v0 }
  0xb2   : > { %1734 = vmatmul.mubr.bf16.vlgmr.msra.gmra.mrb[0].mxu0 %v1996_v17  ;;  %1754 = vmatmul.mubr.bf16.vlgmr.msra.gmra.mrb[0].mxu1 %v1996_v17 }
  0xb3   : > { %1758 = vmatpush3.bf16.msra.mxu0 %v1998_v18  ;;  %1773 = vmatprep.mubr.msk.bf16.mxu0 %vm2264_vm0, %v2263_v0  ;;  %v2022_v18 = vld [vmem:[#allocation9 + $0x80] sm:$0xff]  }
  0xb4   : > { %1759 = vmatprep.subr.bf16.mxu0 %v2263_v0  ;;  %1793 = vmatprep.mubr.msk.bf16.mxu1 %vm2264_vm0, %v2263_v0 }
  0xb5   : > { %1778 = vmatpush3.bf16.msra.mxu1 %v2006_v26  ;;  %v2029_v26 = vld [vmem:[#allocation9 + $0xb8] sm:$0xff]  }
  0xb6   : > { %1779 = vmatprep.subr.bf16.mxu1 %v2263_v0 }
  0xb7   : > { %1760 = vmatpush3.bf16.msra.mxu0 %v1999_v19 }
  0xb8   : > { %1761 = vmatprep.subr.bf16.mxu0 %v2263_v0 }
  0xb9   : > { %1780 = vmatpush3.bf16.msra.mxu1 %v2008_v28  ;;  %v2031_v28 = vld [vmem:[#allocation10 + $0x40] sm:$0xff]  }
  0xba   : > { %1781 = vmatprep.subr.bf16.mxu1 %v2263_v0 }
  0xbb   : > { %1762 = vmatpush3.bf16.msra.mxu0 %v2000_v20  ;;  %v2023_v20 = vld [vmem:[#allocation9 + $0x88] sm:$0xff]  }
  0xbc   : > { %1763 = vmatprep.subr.bf16.mxu0 %v2263_v0 }
  0xbd   : > { %1782 = vmatpush3.bf16.msra.mxu1 %v2010_v30  ;;  %v2033_v30 = vld [vmem:[#allocation10 + $0x48] sm:$0xff]  }
  0xbe   : > { %1783 = vmatprep.subr.bf16.mxu1 %v2263_v0 }
  0xbf   : > { %1764 = vmatpush3.bf16.msra.mxu0 %v2001_v21  ;;  %v2024_v21 = vld [vmem:[#allocation9 + $0x90] sm:$0xff]  }
  0xc0   : > { %1765 = vmatprep.subr.bf16.mxu0 %v2263_v0 }
  0xc1   : > { %1784 = vmatpush3.bf16.msra.mxu1 %v2012_v32  ;;  %v2035_v32 = vld [vmem:[#allocation10 + $0x50] sm:$0xff]  }
  0xc2   : > { %1785 = vmatprep.subr.bf16.mxu1 %v2263_v0 }
  0xc3   : > { %1766 = vmatpush3.bf16.msra.mxu0 %v2002_v22  ;;  %v2025_v22 = vld [vmem:[#allocation9 + $0x98] sm:$0xff]  }
  0xc4   : > { %1767 = vmatprep.subr.bf16.mxu0 %v2263_v0 }
  0xc5   : > { %1786 = vmatpush3.bf16.msra.mxu1 %v2014_v34  ;;  %v2037_v34 = vld [vmem:[#allocation10 + $0x58] sm:$0xff]  }
  0xc6   : > { %1787 = vmatprep.subr.bf16.mxu1 %v2263_v0 }
  0xc7   : > { %1768 = vmatpush3.bf16.msra.mxu0 %v2003_v23  ;;  %v2026_v23 = vld [vmem:[#allocation9 + $0xa0] sm:$0xff]  }
  0xc8   : > { %1769 = vmatprep.subr.bf16.mxu0 %v2263_v0 }
  0xc9   : > { %1788 = vmatpush3.bf16.msra.mxu1 %v2016_v36  ;;  %v2039_v36 = vld [vmem:[#allocation10 + $0x60] sm:$0xff]  }
  0xca   : > { %1789 = vmatprep.subr.bf16.mxu1 %v2263_v0 }
  0xcb   : > { %1770 = vmatpush3.bf16.msra.mxu0 %v2004_v24  ;;  %v2027_v24 = vld [vmem:[#allocation9 + $0xa8] sm:$0xff]  }
  0xcc   : > { %1771 = vmatprep.subr.bf16.mxu0 %v2263_v0 }
  0xcd   : > { %1790 = vmatpush3.bf16.msra.mxu1 %v2018_v38  ;;  %v2041_v38 = vld [vmem:[#allocation10 + $0x68] sm:$0xff]  }
  0xce   : > { %1791 = vmatprep.subr.bf16.mxu1 %v2263_v0 }
  0xcf   : > { %1772 = vmatpush3.bf16.msra.mxu0 %v2005_v25  ;;  %v2028_v25 = vld [vmem:[#allocation9 + $0xb0] sm:$0xff]  }
  0xd0   : > { %1797 = vmatprep.subr.bf16.mxu0 %v2263_v0 }
  0xd1   : > { %1792 = vmatpush3.bf16.msra.mxu1 %v2020_v40  ;;  %v2043_v40 = vld [vmem:[#allocation10 + $0x70] sm:$0xff]  }
  0xd2   : > { %1774 = vmatmul.mubr.bf16.vlgmr.msra.gmra.mrb[4].mxu0 %v1996_v17  ;;  %1817 = vmatprep.subr.bf16.mxu1 %v2263_v0 }
  0xd3   : > { %1813 = vmatprep.mubr.msk.bf16.mxu0 %vm2264_vm0, %v2263_v0  ;;  %1798 = vmatpush3.bf16.msra.mxu0 %v2007_v27  ;;  %v2030_v27 = vld [vmem:[#allocation10] sm:$0xff]  }
  0xd4   : > { %1799 = vmatprep.subr.bf16.mxu0 %v2263_v0 }
  0xd7   : > { %1800 = vmatpush3.bf16.msra.mxu0 %v2009_v29  ;;  %v2032_v29 = vld [vmem:[#allocation10 + $0x8] sm:$0xff]  }
  0xd8   : > { %1801 = vmatprep.subr.bf16.mxu0 %v2263_v0 }
  0xdb   : > { %1802 = vmatpush3.bf16.msra.mxu0 %v2011_v31  ;;  %v2034_v31 = vld [vmem:[#allocation10 + $0x10] sm:$0xff]  }
  0xdc   : > { %1803 = vmatprep.subr.bf16.mxu0 %v2263_v0 }
  0xdf   : > { %1804 = vmatpush3.bf16.msra.mxu0 %v2013_v33  ;;  %v2036_v33 = vld [vmem:[#allocation10 + $0x18] sm:$0xff]  }
  0xe0   : > { %1805 = vmatprep.subr.bf16.mxu0 %v2263_v0 }
  0xe3   : > { %1806 = vmatpush3.bf16.msra.mxu0 %v2015_v35  ;;  %v2038_v35 = vld [vmem:[#allocation10 + $0x20] sm:$0xff]  }
  0xe4   : > { %1807 = vmatprep.subr.bf16.mxu0 %v2263_v0 }
  0xe7   : > { %1808 = vmatpush3.bf16.msra.mxu0 %v2017_v37  ;;  %v2040_v37 = vld [vmem:[#allocation10 + $0x28] sm:$0xff]  }
  0xe8   : > { %1809 = vmatprep.subr.bf16.mxu0 %v2263_v0 }
  0xeb   : > { %1810 = vmatpush3.bf16.msra.mxu0 %v2019_v39  ;;  %v2042_v39 = vld [vmem:[#allocation10 + $0x30] sm:$0xff]  }
  0xec   : > { %1811 = vmatprep.subr.bf16.mxu0 %v2263_v0 }
  0xef   : > { %1812 = vmatpush3.bf16.msra.mxu0 %v2021_v41  ;;  %v2044_v41 = vld [vmem:[#allocation10 + $0x38] sm:$0xff]  }
  0xf0   : > { %1837 = vmatprep.subr.bf16.mxu0 %v2263_v0 }
 0x185   : > { %v468_v44 = vpop.f32.mrb[0].mxu0  ;;  %v574_v47 = vpop.f32.mrb[0].mxu1 }
 0x186   : > { %v687_v45 = vrot.slane %v468_v44, 7  ;;  %v1735_v46 = vpop.f32.mrb[1].mxu0  ;;  %v1755_v49 = vpop.f32.mrb[1].mxu1 }
 0x187   : > { %v471_v48 = vpop.f32.mrb[2].mxu0  ;;  %v577_v52 = vpop.f32.mrb[2].mxu1 }
 0x188   : > { %v688_v50 = vrot.slane %v471_v48, 7  ;;  %v1736_v51 = vpop.f32.mrb[3].mxu0  ;;  %v1756_v53 = vpop.f32.mrb[3].mxu1 }
 0x18a   : > { %v691_v54 = vsel %vm689_vm1, %v688_v50, %v687_v45  ;;  %v690_v55 = vsel %vm689_vm1, %v687_v45, %v688_v50 }
 0x18b   : > { %v696_v56 = vsel %vm353_vm2, %v691_v54, 0.0  ;;  %v710_v57 = vadd.f32 %v690_v55, %v577_v52 }
 0x18c   : > { %v709_v58 = vadd.f32 %v696_v56, %v574_v47 }
 0x1a5   : > { %v680_v60 = vpop.f32.mrb[4].mxu0 }
 0x1a6   : > { %v1775_v61 = vpop.f32.mrb[5].mxu0  ;;  %v698_v1 = vrot.slane %v680_v60, 1 }
 0x1a7   : > { %v683_v63 = vpop.f32.mrb[6].mxu0 }
 0x1a8   : > { %v699_v2 = vrot.slane %v683_v63, 1  ;;  %v1776_v3 = vpop.f32.mrb[7].mxu0 }
 0x1aa   : > { %v701_v4 = vsel %vm700_vm3, %v698_v1, %v699_v2  ;;  %v702_v5 = vsel %vm700_vm3, %v699_v2, %v698_v1 }
 0x1ab   : > { %v708_v7 = vsel %vm356_vm4, %v702_v5, 0.0  ;;  %v711_v8 = vadd.f32 %v709_v58, %v701_v4  ;;  %v1603_v5 = vld [vmem:[%s2764_s5] ss:$0 sm:$0xff] }
 0x1ac   : > { %v712_v9 = vadd.f32 %v710_v57, %v708_v7 }
 0x1ad   : > { %v720_v11 = vadd.f32 %v1578_v6, %v711_v8 }
 0x1ae   : > { %v721_v13 = vadd.f32 %v1578_v6, %v712_v9 }
 0x1af   : > { %v722_v14 = vmul.f32 %v2629_v10, %v720_v11 }
 0x1b0   : > { %v723_v15 = vmul.f32 %v2632_v12, %v721_v13 }
 0x1b1   : > { %v724_v16 = vmax.f32 %v722_v14, 0.0 }
 0x1b2   : > { %v725_v17 = vmax.f32 %v723_v15, 0.0 }
 0x1b4   : > { %v726_v19 = vpack.c.bf16 %v725_v17, %v724_v16  ;;  %v2046_v17 = vld [vmem:[#allocation10 + $0x80] sm:$0xff]  }
 0x1b6   : > { %1794 = vmatmul.mubr.bf16.vlgmr.msra.gmra.mrb[4].mxu1 %v726_v19  ;;  %1814 = vmatmul.mubr.bf16.vlgmr.msra.gmra.mrb[8].mxu0 %v726_v19 }
 0x1b7   : > { %1818 = vmatpush3.bf16.msra.mxu1 %v2022_v18  ;;  %1833 = vmatprep.mubr.msk.bf16.mxu1 %vm2264_vm0, %v2263_v0 }
 0x1b8   : > { %1819 = vmatprep.subr.bf16.mxu1 %v2263_v0  ;;  %1853 = vmatprep.mubr.msk.bf16.mxu0 %vm2264_vm0, %v2263_v0 }
 0x1b9   : > { %1838 = vmatpush3.bf16.msra.mxu0 %v2030_v27 }
 0x1ba   : > { %1839 = vmatprep.subr.bf16.mxu0 %v2263_v0 }
 0x1bb   : > { %1820 = vmatpush3.bf16.msra.mxu1 %v2023_v20  ;;  %v2048_v20 = vld [vmem:[#allocation10 + $0x90] sm:$0xff]  }
 0x1bc   : > { %1821 = vmatprep.subr.bf16.mxu1 %v2263_v0 }
 0x1bd   : > { %1840 = vmatpush3.bf16.msra.mxu0 %v2032_v29 }
 0x1be   : > { %1841 = vmatprep.subr.bf16.mxu0 %v2263_v0 }
 0x1bf   : > { %1822 = vmatpush3.bf16.msra.mxu1 %v2024_v21  ;;  %v2049_v21 = vld [vmem:[#allocation10 + $0x98] sm:$0xff]  }
 0x1c0   : > { %1823 = vmatprep.subr.bf16.mxu1 %v2263_v0 }
 0x1c1   : > { %1842 = vmatpush3.bf16.msra.mxu0 %v2034_v31 }
 0x1c2   : > { %1843 = vmatprep.subr.bf16.mxu0 %v2263_v0 }
 0x1c3   : > { %1824 = vmatpush3.bf16.msra.mxu1 %v2025_v22  ;;  %v2050_v22 = vld [vmem:[#allocation10 + $0xa0] sm:$0xff]  }
 0x1c4   : > { %1825 = vmatprep.subr.bf16.mxu1 %v2263_v0 }
 0x1c5   : > { %1844 = vmatpush3.bf16.msra.mxu0 %v2036_v33 }
 0x1c6   : > { %1845 = vmatprep.subr.bf16.mxu0 %v2263_v0 }
 0x1c7   : > { %1826 = vmatpush3.bf16.msra.mxu1 %v2026_v23  ;;  %v2051_v23 = vld [vmem:[#allocation10 + $0xa8] sm:$0xff]  }
 0x1c8   : > { %1827 = vmatprep.subr.bf16.mxu1 %v2263_v0 }
 0x1c9   : > { %1846 = vmatpush3.bf16.msra.mxu0 %v2038_v35 }
 0x1ca   : > { %1847 = vmatprep.subr.bf16.mxu0 %v2263_v0 }
 0x1cb   : > { %1828 = vmatpush3.bf16.msra.mxu1 %v2027_v24  ;;  %v2052_v24 = vld [vmem:[#allocation10 + $0xb0] sm:$0xff]  }
 0x1cc   : > { %1829 = vmatprep.subr.bf16.mxu1 %v2263_v0 }
 0x1cd   : > { %1848 = vmatpush3.bf16.msra.mxu0 %v2040_v37 }
 0x1ce   : > { %1849 = vmatprep.subr.bf16.mxu0 %v2263_v0 }
 0x1cf   : > { %1830 = vmatpush3.bf16.msra.mxu1 %v2028_v25  ;;  %v2053_v25 = vld [vmem:[#allocation10 + $0xb8] sm:$0xff]  }
 0x1d0   : > { %1831 = vmatprep.subr.bf16.mxu1 %v2263_v0 }
 0x1d1   : > { %1850 = vmatpush3.bf16.msra.mxu0 %v2042_v39 }
 0x1d2   : > { %1851 = vmatprep.subr.bf16.mxu0 %v2263_v0 }
 0x1d3   : > { %1832 = vmatpush3.bf16.msra.mxu1 %v2029_v26 }
 0x1d4   : > { %1857 = vmatprep.subr.bf16.mxu1 %v2263_v0 }
 0x1d5   : > { %1852 = vmatpush3.bf16.msra.mxu0 %v2044_v41 }
 0x1d6   : > { %1834 = vmatmul.mubr.bf16.vlgmr.msra.gmra.mrb[8].mxu1 %v726_v19  ;;  %1877 = vmatprep.subr.bf16.mxu0 %v2263_v0  ;;  %v2047_v19 = vld [vmem:[#allocation10 + $0x88] sm:$0xff]  }
 0x1d7   : > { %1873 = vmatprep.mubr.msk.bf16.mxu1 %vm2264_vm0, %v2263_v0  ;;  %1858 = vmatpush3.bf16.msra.mxu1 %v2031_v28 }
 0x1d8   : > { %1859 = vmatprep.subr.bf16.mxu1 %v2263_v0 }
 0x1db   : > { %1860 = vmatpush3.bf16.msra.mxu1 %v2033_v30 }
 0x1dc   : > { %1861 = vmatprep.subr.bf16.mxu1 %v2263_v0 }
 0x1df   : > { %1862 = vmatpush3.bf16.msra.mxu1 %v2035_v32 }
 0x1e0   : > { %1863 = vmatprep.subr.bf16.mxu1 %v2263_v0 }
 0x1e3   : > { %1864 = vmatpush3.bf16.msra.mxu1 %v2037_v34 }
 0x1e4   : > { %1865 = vmatprep.subr.bf16.mxu1 %v2263_v0 }
 0x1e7   : > { %1866 = vmatpush3.bf16.msra.mxu1 %v2039_v36 }
 0x1e8   : > { %1867 = vmatprep.subr.bf16.mxu1 %v2263_v0 }
 0x1eb   : > { %1868 = vmatpush3.bf16.msra.mxu1 %v2041_v38 }
 0x1ec   : > { %1869 = vmatprep.subr.bf16.mxu1 %v2263_v0 }
 0x1ef   : > { %1870 = vmatpush3.bf16.msra.mxu1 %v2043_v40 }
 0x1f0   : > { %1871 = vmatprep.subr.bf16.mxu1 %v2263_v0 }
 0x1f3   : > { %1872 = vmatpush3.bf16.msra.mxu1 %v2045_v42 }
 0x289   : > { %v825_v44 = vpop.f32.mrb[4].mxu1  ;;  %v931_v45 = vpop.f32.mrb[8].mxu0 }
 0x28a   : > { %v1795_v46 = vpop.f32.mrb[5].mxu1  ;;  %v1815_v47 = vpop.f32.mrb[9].mxu0  ;;  %v1044_v50 = vrot.slane %v825_v44, 7 }
 0x28b   : > { %v828_v48 = vpop.f32.mrb[6].mxu1  ;;  %v934_v49 = vpop.f32.mrb[10].mxu0 }
 0x28c   : > { %v1045_v51 = vrot.slane %v828_v48, 7  ;;  %v1796_v52 = vpop.f32.mrb[7].mxu1  ;;  %v1816_v53 = vpop.f32.mrb[11].mxu0 }
 0x28e   : > { %v1047_v54 = vsel %vm689_vm1, %v1045_v51, %v1044_v50  ;;  %v1046_v55 = vsel %vm689_vm1, %v1044_v50, %v1045_v51 }
 0x28f   : > { %v1048_v56 = vsel %vm353_vm2, %v1047_v54, 0.0  ;;  %v1057_v57 = vadd.f32 %v1046_v55, %v934_v49  ;;  %v1628_v49 = vld [vmem:[%s2766_s7] ss:$0 sm:$0xff] }
 0x290   : > { %v1056_v58 = vadd.f32 %v1048_v56, %v931_v45 }
 0x2a9   : > { %v1037_v60 = vpop.f32.mrb[8].mxu1 }
 0x2aa   : > { %v1835_v61 = vpop.f32.mrb[9].mxu1  ;;  %v1050_v63 = vrot.slane %v1037_v60, 1 }
 0x2ab   : > { %v1040_v62 = vpop.f32.mrb[10].mxu1 }
 0x2ac   : > { %v1051_v1 = vrot.slane %v1040_v62, 1  ;;  %v1836_v2 = vpop.f32.mrb[11].mxu1 }
 0x2ae   : > { %v1052_v3 = vsel %vm700_vm3, %v1050_v63, %v1051_v1  ;;  %v1053_v4 = vsel %vm700_vm3, %v1051_v1, %v1050_v63 }
 0x2af   : > { %v1055_v6 = vsel %vm356_vm4, %v1053_v4, 0.0  ;;  %v1058_v7 = vadd.f32 %v1056_v58, %v1052_v3 }
 0x2b0   : > { %v1059_v8 = vadd.f32 %v1057_v57, %v1055_v6 }
 0x2b1   : > { %v1067_v9 = vadd.f32 %v1603_v5, %v1058_v7 }
 0x2b2   : > { %v1068_v11 = vadd.f32 %v1603_v5, %v1059_v8 }
 0x2b3   : > { %v1069_v13 = vmul.f32 %v2629_v10, %v1067_v9 }
 0x2b4   : > { %v1070_v14 = vmul.f32 %v2632_v12, %v1068_v11 }
 0x2b5   : > { %v1071_v15 = vmax.f32 %v1069_v13, 0.0 }
 0x2b6   : > { %v1072_v16 = vmax.f32 %v1070_v14, 0.0 }
 0x2b8   : > { %v1073_v18 = vpack.c.bf16 %v1072_v16, %v1071_v15 }
 0x2ba   : > { %1854 = vmatmul.mubr.bf16.vlgmr.msra.gmra.mrb[12].mxu0 %v1073_v18  ;;  %1874 = vmatmul.mubr.bf16.vlgmr.msra.gmra.mrb[12].mxu1 %v1073_v18 }
 0x2bb   : > { %1878 = vmatpush3.bf16.msra.mxu0 %v2046_v17  ;;  %1893 = vmatprep.mubr.msk.bf16.mxu0 %vm2264_vm0, %v2263_v0 }
 0x2bc   : > { %1879 = vmatprep.subr.bf16.mxu0 %v2263_v0 }
 0x2bf   : > { %1880 = vmatpush3.bf16.msra.mxu0 %v2047_v19 }
 0x2c0   : > { %1881 = vmatprep.subr.bf16.mxu0 %v2263_v0 }
 0x2c3   : > { %1882 = vmatpush3.bf16.msra.mxu0 %v2048_v20 }
 0x2c4   : > { %1883 = vmatprep.subr.bf16.mxu0 %v2263_v0 }
 0x2c7   : > { %1884 = vmatpush3.bf16.msra.mxu0 %v2049_v21 }
 0x2c8   : > { %1885 = vmatprep.subr.bf16.mxu0 %v2263_v0 }
 0x2cb   : > { %1886 = vmatpush3.bf16.msra.mxu0 %v2050_v22 }
 0x2cc   : > { %1887 = vmatprep.subr.bf16.mxu0 %v2263_v0 }
 0x2cf   : > { %1888 = vmatpush3.bf16.msra.mxu0 %v2051_v23 }
 0x2d0   : > { %1889 = vmatprep.subr.bf16.mxu0 %v2263_v0 }
 0x2d3   : > { %1890 = vmatpush3.bf16.msra.mxu0 %v2052_v24 }
 0x2d4   : > { %1891 = vmatprep.subr.bf16.mxu0 %v2263_v0 }
 0x2d7   : > { %1892 = vmatpush3.bf16.msra.mxu0 %v2053_v25 }
 0x2da   : > { %1894 = vmatmul.mubr.bf16.vlgmr.msra.gmra.mrb[16].mxu0 %v1073_v18 }
 0x38d   : > { %v1172_v26 = vpop.f32.mrb[12].mxu0  ;;  %v1278_v27 = vpop.f32.mrb[12].mxu1 }
 0x38e   : > { %v1855_v28 = vpop.f32.mrb[13].mxu0  ;;  %v1875_v29 = vpop.f32.mrb[13].mxu1  ;;  %v1391_v32 = vrot.slane %v1172_v26, 7 }
 0x38f   : > { %v1175_v30 = vpop.f32.mrb[14].mxu0  ;;  %v1281_v31 = vpop.f32.mrb[14].mxu1 }
 0x390   : > { %v1392_v33 = vrot.slane %v1175_v30, 7  ;;  %v1856_v34 = vpop.f32.mrb[15].mxu0  ;;  %v1876_v35 = vpop.f32.mrb[15].mxu1 }
 0x392   : > { %v1394_v36 = vsel %vm689_vm1, %v1392_v33, %v1391_v32  ;;  %v1393_v37 = vsel %vm689_vm1, %v1391_v32, %v1392_v33 }
 0x393   : > { %v1395_v0 = vsel %vm353_vm2, %v1394_v36, 0.0  ;;  %v1404_v38 = vadd.f32 %v1393_v37, %v1281_v31 }
 0x394   : > { %v1403_v39 = vadd.f32 %v1395_v0, %v1278_v27 }
 0x3ad   : > { %v1384_v40 = vpop.f32.mrb[16].mxu0 }
 0x3ae   : > { %v1895_v41 = vpop.f32.mrb[17].mxu0  ;;  %v1397_v44 = vrot.slane %v1384_v40, 1 }
 0x3af   : > { %v1387_v42 = vpop.f32.mrb[18].mxu0 }
 0x3b0   : > { %v1398_v45 = vrot.slane %v1387_v42, 1  ;;  %v1896_v46 = vpop.f32.mrb[19].mxu0 }
 0x3b2   : > { %v1399_v47 = vsel %vm700_vm3, %v1397_v44, %v1398_v45  ;;  %v1400_v48 = vsel %vm700_vm3, %v1398_v45, %v1397_v44 }
 0x3b3   : > { %v1402_v50 = vsel %vm356_vm4, %v1400_v48, 0.0  ;;  %v1405_v51 = vadd.f32 %v1403_v39, %v1399_v47 }
 0x3b4   : > { %v1406_v52 = vadd.f32 %v1404_v38, %v1402_v50 }
 0x3b5   : > { %v1414_v53 = vadd.f32 %v1628_v49, %v1405_v51 }
 0x3b6   : > { %v1415_v54 = vadd.f32 %v1628_v49, %v1406_v52 }
 0x3b7   : > { %v1416_v55 = vmul.f32 %v2629_v10, %v1414_v53 }
 0x3b8   : > { %v1417_v43 = vmul.f32 %v2632_v12, %v1415_v54 }
 0x3b9   : > { %1418 = vst [vmem:[%s345_s29] sm:$0xff] %v1416_v55 }
 0x3ba   : > { %1419 = vst [vmem:[%s345_s29 + $0x8] sm:$0xff] %v1417_v43 }
 0x3bb   : > { %2191 = shalt.err (!%p2188_p7)
}
 0x3bc   : > { %s2192_s23 = scalar_lea.hbm %s2712_s11, 256  ;;  %s2196_s25 = scalar_lea.hbm %s2767_s8, 512 }
 0x3bd   : > { %p2193_p12 = scmp.ne.s32.totalorder %s2712_s11, %s2192_s23  ;;  %p2197_p11 = scmp.lt.u32.totalorder %s2712_s11, %s2767_s8 }
 0x3be   : > { %p2198_p2 = scmp.lt.u32.totalorder %s2196_s25, %s2192_s23  ;;  %p2200_p13 = scmp.lt.u32.totalorder %s2192_s23, %s2712_s11 }
 0x3bf   : > { %p2194_p3 = pnand %p2193_p12, %p2479_p8 }
 0x3c0   : > { %p2199_p9 = por %p2198_p2, %p2197_p11 }
 0x3c1   : > { %p2195_p0 = pneg %p2194_p3 }
 0x3c2   : > { %p2201_p6 = por %p2200_p13, %p2199_p9 }
 0x3c4   : > { %p2202_p10 = pnand %p2201_p6, %p2195_p0 }
 0x3c6   : > { %2205 = shalt.err (!%p2202_p10)
}
 0x3c7   : > { %s2266_s14 = smov 128   ;;  %s2267_s24 = smov 8  }
 0x3c8   : > { %1911 = dma.vmem_to_hbm [thread:$0]  (%p2479_p8), %s2714_s19, 256, %s2712_s11, %s1421_s0, %s2266_s14, %s2266_s14, %s2267_s24  }
 0x3c9 PF: > { %s2787_s20 = sld [smem:[#allocation18_spill]]  ;;  %s1449_s22 = sand.u32 1, %s2242_s15  }
 0x3ca   : > { %p2789_p4 = scmp.ge.s32.totalorder %s2254_s18, 2  ;;  %s1450_s26 = scalar_lea.sflag [#allocation6], %s1449_s22 }
 0x3cf   : > { %p2788_p1 = scmp.ne.s32.totalorder %s2787_s20, 0 }
 0x3d1   : > { %p1928_p5 = pnand %p2789_p4, %p2788_p1 }
 0x3d3   : > { %2237 = dma.done.wait (!%p1928_p5), %s1450_s26, 256  }
 0x3d4   : > { %2239 = vsyncadd (!%p1928_p5), %s1450_s26, 4294967040  ;;  %p27_p7 = scmp.ge.s32.totalorder %s2465_s13, 4   ;;  %s2790_s15 = smov %s2246_s16 }
 0x3d5   : > { %s2791_s16 = smov %s2250_s17  ;;  %s2792_s17 = smov %s2475_s9 }
 0x3d6   : > { %s2793_s18 = smov %s2465_s13  ;;  %29 = sbr.rel (!%p27_p7) target bundleno = 19 (0x13), region = 111 }
 0x3dd   :  { %1455 = vsyncpa [#allocation5], 1 }
 0x3de   :  { %1457 = vsyncpa [#allocation5 + $0x1], 1 }
 0x3df   :  { %1458 = vsyncpa [#allocation8], 1 }
 0x3e0   :  { %1459 = vsyncpa [#allocation11], 1 }
 0x3e1   :  { %1460 = vsyncpa [#allocation6], 1 }
 0x3e2   :  { %1462 = vsyncpa [#allocation6 + $0x1], 1 }

</bundles_post_ra>
